<compile_context>
chip_gen: v5e
topology: v5e:2x2
jax: 0.10.0
libtpu: 0.0.40
codegen_flags: <defaults>
</compile_context>

<pallas_src>
import numpy as np
import jax
import jax.numpy as jnp
from jax.experimental import pallas as pl
from jax.experimental.pallas import tpu as pltpu


# Deterministic basis (identical to the module's __init__).
HERMITE = np.array([[2, -2, 1, 1],
                    [-3, 3, -2, -1],
                    [0, 0, 1, 0],
                    [1, 0, 0, 0]], dtype=np.float64)
CATMULL = np.array([[0, 1, 0, 0],
                    [0, 0, 1, 0],
                    [-0.5, 0, 0.5, 0],
                    [0, -0.5, 0, 0.5]], dtype=np.float64)
UNIFORM_BASIS = HERMITE @ CATMULL  # 4x4


def _generation_vmem_cap():
    """Per-core VMEM request ceiling, generation aware (v7x has 64 MiB/TC)."""
    try:
        phys = int(pltpu.get_tpu_info().vmem_capacity_bytes)
    except Exception:
        phys = 64 << 20              # unknown -> assume the smallest (v7x-sized) VMEM
    if phys <= (64 << 20):
        return 48 << 20              # v7x: leave headroom for Mosaic internal scratch
    return 100 << 20                 # v5e/v6e: 128 MiB physical


def _make_spline_kernel(dims, basis):
    """dims = (Z, Y, X, XP, CP): true axis sizes, padded X, padded channels."""
    Z, Y, X, XP, CP = dims
    YXP = Y * XP
    b = [[float(v) for v in row] for row in np.asarray(basis)]

    def tap_weights(coord_row, size):
        """4 Catmull-Rom tap coefficients + clipped tap indices for one axis."""
        i0 = coord_row.astype(jnp.int32)                       # trunc == torch .to(int32)
        s = jnp.clip(coord_row - i0.astype(jnp.float32), 0.0, 1.0)
        s2 = s * s
        s3 = s2 * s
        cks = [s3 * b[0][k] + s2 * b[1][k] + s * b[2][k] + b[3][k] for k in range(4)]
        iks = [jnp.clip(i0 - 1 + k, 0, size - 1) for k in range(4)]
        return cks, iks                                         # lists of (1, tn)

    def axis_weights(coord_row, size, n_rows, tn):
        """Dense one-hot weight matrix (n_rows, tn) along one axis."""
        cks, iks = tap_weights(coord_row, size)
        rows = jax.lax.broadcasted_iota(jnp.int32, (n_rows, tn), 0)
        w = jnp.zeros((n_rows, tn), jnp.float32)
        for k in range(4):
            # Clipped duplicate taps accumulate (matches the gather+sum reference);
            # pure select, no bool->f32 cast + multiply.
            w = jnp.where(rows == iks[k], w + cks[k], w)
        return w

    def kernel(coords_ref, knots_ref, out_ref):
        tn = coords_ref.shape[1]
        coords = coords_ref[...]                                # (8, tn): rows 0,1,2 = z,y,x

        # Separable y/x weights, built ONCE per point tile, Kronecker-expanded into
        # a single (Y*XP, tn) matrix (XP % 8 == 0 -> reshape is a layout no-op).
        wy = axis_weights(coords[1:2, :], Y, Y, tn)             # (Y,  tn)
        wx = axis_weights(coords[2:3, :], X, XP, tn)            # (XP, tn), rows >= X stay 0
        wyx = (wy[:, None, :] * wx[None, :, :]).reshape(YXP, tn)

        # z tap coefficients / clipped indices (4 rows of (1, tn)).
        czs, izs = tap_weights(coords[0:1, :], Z)

        def zstep(z, acc):
            # One z strip of the resident knots slab: small MXU matmul, then weight
            # the (CP, tn) partial by this strip's z coefficient row.
            # Mosaic's f32 matmul path is full precision; if the tolerance ever
            # regresses (e.g. v7x), add precision=jax.lax.Precision.HIGHEST here.
            pz = jnp.dot(knots_ref[z], wyx,
                         preferred_element_type=jnp.float32)    # (CP, tn)
            wz = jnp.zeros((1, tn), jnp.float32)
            for k in range(4):
                wz = jnp.where(izs[k] == z, wz + czs[k], wz)
            return acc + pz * wz

        acc0 = jnp.zeros((CP, tn), jnp.float32)
        out_ref[...] = jax.lax.fori_loop(0, Z, zstep, acc0, unroll=(Z <= 16))

    return kernel


class CatmullRomSpline4DUniformPallas:
    """JAX/Pallas port of CatmullRomSpline4DUniform."""

    def __init__(self, knots, depths, tile_n=256):
        self.knots = jnp.asarray(knots, dtype=jnp.float32)       # (D, Z, Y, X, C)
        assert self.knots.ndim == 5
        self.depths = np.asarray(depths, dtype=np.float64)
        self.time_diffs = np.diff(self.depths, prepend=0)         # parity (unused in forward)
        self.uniform_basis = UNIFORM_BASIS
        self.tile_n = int(tile_n)                                 # multiple of 128

        D, Z, Y, X, C = self.knots.shape
        self._dims = (D, Z, Y, X, C)
        self._cp = ((C + 7) // 8) * 8                             # channels padded to sublanes
        self._xp = ((X + 7) // 8) * 8                             # X padded so reshapes are free

    def get_depth_coords(self, input_depth):
        # TODO(synk): scalar np.searchsorted depth lookup stays on host (pure glue).
        ind = int(np.searchsorted(self.depths, input_depth, side='right'))
        # Guard out-of-range depths (reference would index-error / wrap the divisor).
        ind = int(np.clip(ind, 1, len(self.depths) - 1))
        norm = (input_depth - self.depths[ind - 1]) / (self.depths[ind] - self.depths[ind - 1])
        return ind - 1, norm

    def _depth_collapsed_knots(self, depth):
        """Pre-contract knots over depth: identical 4 taps/weights for every point."""
        D, Z, Y, X, C = self._dims
        depth_ind, depth_r = self.get_depth_coords(depth)
        coord = np.float32(depth_ind + depth_r)
        i0 = np.int32(coord)                                      # trunc toward zero
        s = float(np.clip(np.float32(coord) - np.float32(i0), 0.0, 1.0))
        taps = np.clip(int(i0) - 1 + np.arange(4), 0, D - 1)
        wd = (np.array([s ** 3, s ** 2, s, 1.0]) @ self.uniform_basis).astype(np.float32)
        # (4, Z, Y, X, C) gather + tiny weighted sum in plain XLA (glue).
        return jnp.tensordot(jnp.asarray(wd), self.knots[taps], axes=1)   # (Z, Y, X, C)

    def forward(self, idx, depth):
        D, Z, Y, X, C = self._dims
        CP, XP = self._cp, self._xp
        YXP = Y * XP
        tn = self.tile_n

        # --- host/XLA prep (glue) ---
        knots_d = self._depth_collapsed_knots(depth)              # (Z, Y, X, C)
        kt = jnp.transpose(knots_d, (0, 3, 1, 2))                 # (Z, C, Y, X) channel-major
        kt = jnp.pad(kt, ((0, 0), (0, CP - C), (0, 0), (0, XP - X)))
        kt = kt.reshape(Z, CP, YXP)                               # resident knots slab

        idx = jnp.asarray(idx, dtype=jnp.float32)                 # (N, 3) zyx
        n = idx.shape[0]
        n_pad = int(pl.cdiv(n, tn)) * tn
        # transposed, lane-dense coordinates; rows 0..2 = z, y, x; rows 3..7 padding
        coords = jnp.zeros((8, n_pad), jnp.float32).at[0:3, :n].set(idx.T)

        kernel = _make_spline_kernel((Z, Y, X, XP, CP), self.uniform_basis)

        # --- generation-aware VMEM budget ---
        knot_bytes = Z * CP * YXP * 4
        coord_bytes = 8 * tn * 4
        out_bytes = CP * tn * 4
        live_bytes = (YXP + Y + XP + 4 * CP + 32) * tn * 4        # wyx/wy/wx/acc/iotas etc.
        need = 2 * (knot_bytes + coord_bytes + out_bytes) + 2 * live_bytes + (8 << 20)
        cap = _generation_vmem_cap()
        vmem_limit = int(min(cap, max(32 << 20, need)))
        # TODO(synk): when `need` exceeds `cap` (huge PSF slabs / channel counts), add a
        # z-chunk streaming grid + windowed-gather (scalar-prefetch window offsets)
        # fallback instead of relying on full knots residency.

        out = pl.pallas_call(
            kernel,
            out_shape=jax.ShapeDtypeStruct((CP, n_pad), jnp.float32),
            grid_spec=pltpu.PrefetchScalarGridSpec(
                num_scalar_prefetch=0,
                grid=(n_pad // tn,),                              # point tiles only
                in_specs=[
                    pl.BlockSpec((8, tn), lambda i: (0, i)),          # coords tile
                    pl.BlockSpec((Z, CP, YXP), lambda i: (0, 0, 0)),  # knots: resident, DMA'd once
                ],
                out_specs=pl.BlockSpec((CP, tn), lambda i: (0, i)),   # lane-dense output tile
            ),
            compiler_params=pltpu.CompilerParams(
                dimension_semantics=("parallel",),
                vmem_limit_bytes=vmem_limit),
        )(coords, kt)

        # TODO(synk): callers that can consume channel-major output should take
        # out[:C, :n] directly and skip this extra XLA transpose pass.
        return out[:C, :n].T                                      # (N, C); C=1 == 4D-knots case


# ----------------------------- numpy reference ------------------------------
def _ref_spline_idx(coord, size, basis):
    i0 = coord.astype(np.int32)
    s = np.clip(coord - i0, 0.0, 1.0)
    inds = np.clip((i0.astype(np.int64) - 1)[:, None] + np.arange(4)[None, :], 0, size - 1)
    p = s[:, None].astype(np.float64) ** np.arange(3, -1, -1)[None, :]
    return inds, p @ basis


def reference_forward(knots, depths, idx, depth):
    """Pure numpy replica of the PyTorch forward (knots: [D,Z,Y,X,C])."""
    knots = np.asarray(knots, np.float64)
    ind = int(np.searchsorted(depths, depth, side='right'))
    norm = (depth - depths[ind - 1]) / (depths[ind] - depths[ind - 1])
    depth_idx = np.full(idx.shape[0], np.float32(ind - 1 + norm), dtype=np.float32)
    idp, cd = _ref_spline_idx(depth_idx, knots.shape[0], UNIFORM_BASIS)
    iz, cz = _ref_spline_idx(idx[:, 0], knots.shape[1], UNIFORM_BASIS)
    iy, cy = _ref_spline_idx(idx[:, 1], knots.shape[2], UNIFORM_BASIS)
    ix, cx = _ref_spline_idx(idx[:, 2], knots.shape[3], UNIFORM_BASIS)
    sel = knots[idp[:, :, None, None, None], iz[:, None, :, None, None],
                iy[:, None, None, :, None], ix[:, None, None, None, :]]  # (N,4,4,4,4,C)
    return (sel * cd[:, :, None, None, None, None] * cz[:, None, :, None, None, None]
            * cy[:, None, None, :, None, None] * cx[:, None, None, None, :, None]).sum((1, 2, 3, 4))


if __name__ == "__main__":
    key = jax.random.PRNGKey(0)
    D, Z, Y, X, C = 8, 8, 8, 8, 4
    N = 300   # exercises multi-tile + point padding at tile_n=256

    k_knots, k_idx = jax.random.split(key)
    knots = jax.random.normal(k_knots, (D, Z, Y, X, C), dtype=jnp.float32)
    # sub-pixel z, y, x coordinates (interior range; boundary clipping matches the
    # reference either way)
    idx = jax.random.uniform(k_idx, (N, 3), dtype=jnp.float32, minval=0.2, maxval=Z - 1.2)

    depths = np.arange(D, dtype=np.float64)   # uniform depth grid, len = D
    depth = 3.25

    spline = CatmullRomSpline4DUniformPallas(knots, depths, tile_n=256)
    out = spline.forward(idx, depth)
    out = jax.block_until_ready(out)

    ref = reference_forward(np.asarray(knots), depths, np.asarray(idx), depth)
    assert out.shape == (N, C), out.shape
    assert out.dtype == jnp.float32
    max_err = float(np.max(np.abs(np.asarray(out, np.float64) - ref)))
    assert max_err < 1e-3, f"max abs err {max_err}"
    print("KERNEL_OK")
</pallas_src>

<mosaic_0001>
module attributes {stable_mosaic.version = 11 : i64} {
  func.func @kernel(%arg0: i32, %arg1: memref<8x256xf32, #tpu.memory_space<vmem>>, %arg2: memref<8x8x64xf32, #tpu.memory_space<vmem>>, %arg3: memref<8x256xf32, #tpu.memory_space<vmem>>) attributes {dimension_semantics = [#tpu.dimension_semantics<parallel>], iteration_bounds = array<i64: 2>, scalar_prefetch = 0 : i64, scratch_operands = 0 : i64, tpu.core_type = #tpu.core_type<tc>, window_params = [{transform_indices = @transform_0, window_bounds = array<i64: 8, 256>}, {pipeline_mode = #tpu.pipeline_mode<synchronous>, transform_indices = @transform_1, window_bounds = array<i64: 8, 8, 64>}, {transform_indices = @transform_2, window_bounds = array<i64: 8, 256>}]} {
    %c0 = arith.constant 0 : index
    %c0_0 = arith.constant 0 : index
    %0 = vector.load %arg1[%c0, %c0_0] : memref<8x256xf32, #tpu.memory_space<vmem>>, vector<8x256xf32>
    %1 = vector.extract_strided_slice %0 {offsets = [1, 0], sizes = [1, 256], strides = [1, 1]} : vector<8x256xf32> to vector<1x256xf32>
    %2 = arith.fptosi %1 : vector<1x256xf32> to vector<1x256xi32>
    %3 = arith.sitofp %2 : vector<1x256xi32> to vector<1x256xf32>
    %4 = arith.subf %1, %3 : vector<1x256xf32>
    %cst = arith.constant 0.000000e+00 : f32
    %cst_1 = arith.constant 1.000000e+00 : f32
    %5 = vector.broadcast %cst : f32 to vector<1x256xf32>
    %6 = arith.maximumf %5, %4 : vector<1x256xf32>
    %7 = vector.broadcast %cst_1 : f32 to vector<1x256xf32>
    %8 = arith.minimumf %7, %6 : vector<1x256xf32>
    %9 = arith.mulf %8, %8 : vector<1x256xf32>
    %10 = arith.mulf %9, %8 : vector<1x256xf32>
    %cst_2 = arith.constant -5.000000e-01 : f32
    %11 = vector.broadcast %cst_2 : f32 to vector<1x256xf32>
    %12 = arith.mulf %10, %11 : vector<1x256xf32>
    %cst_3 = arith.constant 1.000000e+00 : f32
    %13 = vector.broadcast %cst_3 : f32 to vector<1x256xf32>
    %14 = arith.mulf %9, %13 : vector<1x256xf32>
    %15 = arith.addf %12, %14 : vector<1x256xf32>
    %cst_4 = arith.constant -5.000000e-01 : f32
    %16 = vector.broadcast %cst_4 : f32 to vector<1x256xf32>
    %17 = arith.mulf %8, %16 : vector<1x256xf32>
    %18 = arith.addf %15, %17 : vector<1x256xf32>
    %cst_5 = arith.constant 0.000000e+00 : f32
    %19 = vector.broadcast %cst_5 : f32 to vector<1x256xf32>
    %20 = arith.addf %18, %19 : vector<1x256xf32>
    %cst_6 = arith.constant 1.500000e+00 : f32
    %21 = vector.broadcast %cst_6 : f32 to vector<1x256xf32>
    %22 = arith.mulf %10, %21 : vector<1x256xf32>
    %cst_7 = arith.constant -2.500000e+00 : f32
    %23 = vector.broadcast %cst_7 : f32 to vector<1x256xf32>
    %24 = arith.mulf %9, %23 : vector<1x256xf32>
    %25 = arith.addf %22, %24 : vector<1x256xf32>
    %cst_8 = arith.constant 0.000000e+00 : f32
    %26 = vector.broadcast %cst_8 : f32 to vector<1x256xf32>
    %27 = arith.mulf %8, %26 : vector<1x256xf32>
    %28 = arith.addf %25, %27 : vector<1x256xf32>
    %cst_9 = arith.constant 1.000000e+00 : f32
    %29 = vector.broadcast %cst_9 : f32 to vector<1x256xf32>
    %30 = arith.addf %28, %29 : vector<1x256xf32>
    %cst_10 = arith.constant -1.500000e+00 : f32
    %31 = vector.broadcast %cst_10 : f32 to vector<1x256xf32>
    %32 = arith.mulf %10, %31 : vector<1x256xf32>
    %cst_11 = arith.constant 2.000000e+00 : f32
    %33 = vector.broadcast %cst_11 : f32 to vector<1x256xf32>
    %34 = arith.mulf %9, %33 : vector<1x256xf32>
    %35 = arith.addf %32, %34 : vector<1x256xf32>
    %cst_12 = arith.constant 5.000000e-01 : f32
    %36 = vector.broadcast %cst_12 : f32 to vector<1x256xf32>
    %37 = arith.mulf %8, %36 : vector<1x256xf32>
    %38 = arith.addf %35, %37 : vector<1x256xf32>
    %cst_13 = arith.constant 0.000000e+00 : f32
    %39 = vector.broadcast %cst_13 : f32 to vector<1x256xf32>
    %40 = arith.addf %38, %39 : vector<1x256xf32>
    %cst_14 = arith.constant 5.000000e-01 : f32
    %41 = vector.broadcast %cst_14 : f32 to vector<1x256xf32>
    %42 = arith.mulf %10, %41 : vector<1x256xf32>
    %cst_15 = arith.constant -5.000000e-01 : f32
    %43 = vector.broadcast %cst_15 : f32 to vector<1x256xf32>
    %44 = arith.mulf %9, %43 : vector<1x256xf32>
    %45 = arith.addf %42, %44 : vector<1x256xf32>
    %cst_16 = arith.constant 0.000000e+00 : f32
    %46 = vector.broadcast %cst_16 : f32 to vector<1x256xf32>
    %47 = arith.mulf %8, %46 : vector<1x256xf32>
    %48 = arith.addf %45, %47 : vector<1x256xf32>
    %cst_17 = arith.constant 0.000000e+00 : f32
    %49 = vector.broadcast %cst_17 : f32 to vector<1x256xf32>
    %50 = arith.addf %48, %49 : vector<1x256xf32>
    %c1_i32 = arith.constant 1 : i32
    %51 = vector.broadcast %c1_i32 : i32 to vector<1x256xi32>
    %52 = arith.subi %2, %51 : vector<1x256xi32>
    %c0_i32 = arith.constant 0 : i32
    %53 = vector.broadcast %c0_i32 : i32 to vector<1x256xi32>
    %54 = arith.addi %52, %53 : vector<1x256xi32>
    %c0_i32_18 = arith.constant 0 : i32
    %c7_i32 = arith.constant 7 : i32
    %55 = vector.broadcast %c0_i32_18 : i32 to vector<1x256xi32>
    %56 = arith.maxsi %55, %54 : vector<1x256xi32>
    %57 = vector.broadcast %c7_i32 : i32 to vector<1x256xi32>
    %58 = arith.minsi %57, %56 : vector<1x256xi32>
    %c1_i32_19 = arith.constant 1 : i32
    %59 = vector.broadcast %c1_i32_19 : i32 to vector<1x256xi32>
    %60 = arith.subi %2, %59 : vector<1x256xi32>
    %c1_i32_20 = arith.constant 1 : i32
    %61 = vector.broadcast %c1_i32_20 : i32 to vector<1x256xi32>
    %62 = arith.addi %60, %61 : vector<1x256xi32>
    %c0_i32_21 = arith.constant 0 : i32
    %c7_i32_22 = arith.constant 7 : i32
    %63 = vector.broadcast %c0_i32_21 : i32 to vector<1x256xi32>
    %64 = arith.maxsi %63, %62 : vector<1x256xi32>
    %65 = vector.broadcast %c7_i32_22 : i32 to vector<1x256xi32>
    %66 = arith.minsi %65, %64 : vector<1x256xi32>
    %c1_i32_23 = arith.constant 1 : i32
    %67 = vector.broadcast %c1_i32_23 : i32 to vector<1x256xi32>
    %68 = arith.subi %2, %67 : vector<1x256xi32>
    %c2_i32 = arith.constant 2 : i32
    %69 = vector.broadcast %c2_i32 : i32 to vector<1x256xi32>
    %70 = arith.addi %68, %69 : vector<1x256xi32>
    %c0_i32_24 = arith.constant 0 : i32
    %c7_i32_25 = arith.constant 7 : i32
    %71 = vector.broadcast %c0_i32_24 : i32 to vector<1x256xi32>
    %72 = arith.maxsi %71, %70 : vector<1x256xi32>
    %73 = vector.broadcast %c7_i32_25 : i32 to vector<1x256xi32>
    %74 = arith.minsi %73, %72 : vector<1x256xi32>
    %c1_i32_26 = arith.constant 1 : i32
    %75 = vector.broadcast %c1_i32_26 : i32 to vector<1x256xi32>
    %76 = arith.subi %2, %75 : vector<1x256xi32>
    %c3_i32 = arith.constant 3 : i32
    %77 = vector.broadcast %c3_i32 : i32 to vector<1x256xi32>
    %78 = arith.addi %76, %77 : vector<1x256xi32>
    %c0_i32_27 = arith.constant 0 : i32
    %c7_i32_28 = arith.constant 7 : i32
    %79 = vector.broadcast %c0_i32_27 : i32 to vector<1x256xi32>
    %80 = arith.maxsi %79, %78 : vector<1x256xi32>
    %81 = vector.broadcast %c7_i32_28 : i32 to vector<1x256xi32>
    %82 = arith.minsi %81, %80 : vector<1x256xi32>
    %83 = tpu.iota {dimensions = array<i32: 0>} : vector<8x256xi32>
    %cst_29 = arith.constant 0.000000e+00 : f32
    %84 = vector.broadcast %cst_29 : f32 to vector<8x256xf32>
    %85 = vector.broadcast %58 : vector<1x256xi32> to vector<8x256xi32>
    %86 = arith.cmpi eq, %83, %85 : vector<8x256xi32>
    %87 = vector.broadcast %20 : vector<1x256xf32> to vector<8x256xf32>
    %88 = arith.addf %84, %87 : vector<8x256xf32>
    %89 = arith.select %86, %88, %84 : vector<8x256xi1>, vector<8x256xf32>
    %90 = vector.broadcast %66 : vector<1x256xi32> to vector<8x256xi32>
    %91 = arith.cmpi eq, %83, %90 : vector<8x256xi32>
    %92 = vector.broadcast %30 : vector<1x256xf32> to vector<8x256xf32>
    %93 = arith.addf %89, %92 : vector<8x256xf32>
    %94 = arith.select %91, %93, %89 : vector<8x256xi1>, vector<8x256xf32>
    %95 = vector.broadcast %74 : vector<1x256xi32> to vector<8x256xi32>
    %96 = arith.cmpi eq, %83, %95 : vector<8x256xi32>
    %97 = vector.broadcast %40 : vector<1x256xf32> to vector<8x256xf32>
    %98 = arith.addf %94, %97 : vector<8x256xf32>
    %99 = arith.select %96, %98, %94 : vector<8x256xi1>, vector<8x256xf32>
    %100 = vector.broadcast %82 : vector<1x256xi32> to vector<8x256xi32>
    %101 = arith.cmpi eq, %83, %100 : vector<8x256xi32>
    %102 = vector.broadcast %50 : vector<1x256xf32> to vector<8x256xf32>
    %103 = arith.addf %99, %102 : vector<8x256xf32>
    %104 = arith.select %101, %103, %99 : vector<8x256xi1>, vector<8x256xf32>
    %105 = vector.extract_strided_slice %0 {offsets = [2, 0], sizes = [1, 256], strides = [1, 1]} : vector<8x256xf32> to vector<1x256xf32>
    %106 = arith.fptosi %105 : vector<1x256xf32> to vector<1x256xi32>
    %107 = arith.sitofp %106 : vector<1x256xi32> to vector<1x256xf32>
    %108 = arith.subf %105, %107 : vector<1x256xf32>
    %cst_30 = arith.constant 0.000000e+00 : f32
    %cst_31 = arith.constant 1.000000e+00 : f32
    %109 = vector.broadcast %cst_30 : f32 to vector<1x256xf32>
    %110 = arith.maximumf %109, %108 : vector<1x256xf32>
    %111 = vector.broadcast %cst_31 : f32 to vector<1x256xf32>
    %112 = arith.minimumf %111, %110 : vector<1x256xf32>
    %113 = arith.mulf %112, %112 : vector<1x256xf32>
    %114 = arith.mulf %113, %112 : vector<1x256xf32>
    %cst_32 = arith.constant -5.000000e-01 : f32
    %115 = vector.broadcast %cst_32 : f32 to vector<1x256xf32>
    %116 = arith.mulf %114, %115 : vector<1x256xf32>
    %cst_33 = arith.constant 1.000000e+00 : f32
    %117 = vector.broadcast %cst_33 : f32 to vector<1x256xf32>
    %118 = arith.mulf %113, %117 : vector<1x256xf32>
    %119 = arith.addf %116, %118 : vector<1x256xf32>
    %cst_34 = arith.constant -5.000000e-01 : f32
    %120 = vector.broadcast %cst_34 : f32 to vector<1x256xf32>
    %121 = arith.mulf %112, %120 : vector<1x256xf32>
    %122 = arith.addf %119, %121 : vector<1x256xf32>
    %cst_35 = arith.constant 0.000000e+00 : f32
    %123 = vector.broadcast %cst_35 : f32 to vector<1x256xf32>
    %124 = arith.addf %122, %123 : vector<1x256xf32>
    %cst_36 = arith.constant 1.500000e+00 : f32
    %125 = vector.broadcast %cst_36 : f32 to vector<1x256xf32>
    %126 = arith.mulf %114, %125 : vector<1x256xf32>
    %cst_37 = arith.constant -2.500000e+00 : f32
    %127 = vector.broadcast %cst_37 : f32 to vector<1x256xf32>
    %128 = arith.mulf %113, %127 : vector<1x256xf32>
    %129 = arith.addf %126, %128 : vector<1x256xf32>
    %cst_38 = arith.constant 0.000000e+00 : f32
    %130 = vector.broadcast %cst_38 : f32 to vector<1x256xf32>
    %131 = arith.mulf %112, %130 : vector<1x256xf32>
    %132 = arith.addf %129, %131 : vector<1x256xf32>
    %cst_39 = arith.constant 1.000000e+00 : f32
    %133 = vector.broadcast %cst_39 : f32 to vector<1x256xf32>
    %134 = arith.addf %132, %133 : vector<1x256xf32>
    %cst_40 = arith.constant -1.500000e+00 : f32
    %135 = vector.broadcast %cst_40 : f32 to vector<1x256xf32>
    %136 = arith.mulf %114, %135 : vector<1x256xf32>
    %cst_41 = arith.constant 2.000000e+00 : f32
    %137 = vector.broadcast %cst_41 : f32 to vector<1x256xf32>
    %138 = arith.mulf %113, %137 : vector<1x256xf32>
    %139 = arith.addf %136, %138 : vector<1x256xf32>
    %cst_42 = arith.constant 5.000000e-01 : f32
    %140 = vector.broadcast %cst_42 : f32 to vector<1x256xf32>
    %141 = arith.mulf %112, %140 : vector<1x256xf32>
    %142 = arith.addf %139, %141 : vector<1x256xf32>
    %cst_43 = arith.constant 0.000000e+00 : f32
    %143 = vector.broadcast %cst_43 : f32 to vector<1x256xf32>
    %144 = arith.addf %142, %143 : vector<1x256xf32>
    %cst_44 = arith.constant 5.000000e-01 : f32
    %145 = vector.broadcast %cst_44 : f32 to vector<1x256xf32>
    %146 = arith.mulf %114, %145 : vector<1x256xf32>
    %cst_45 = arith.constant -5.000000e-01 : f32
    %147 = vector.broadcast %cst_45 : f32 to vector<1x256xf32>
    %148 = arith.mulf %113, %147 : vector<1x256xf32>
    %149 = arith.addf %146, %148 : vector<1x256xf32>
    %cst_46 = arith.constant 0.000000e+00 : f32
    %150 = vector.broadcast %cst_46 : f32 to vector<1x256xf32>
    %151 = arith.mulf %112, %150 : vector<1x256xf32>
    %152 = arith.addf %149, %151 : vector<1x256xf32>
    %cst_47 = arith.constant 0.000000e+00 : f32
    %153 = vector.broadcast %cst_47 : f32 to vector<1x256xf32>
    %154 = arith.addf %152, %153 : vector<1x256xf32>
    %c1_i32_48 = arith.constant 1 : i32
    %155 = vector.broadcast %c1_i32_48 : i32 to vector<1x256xi32>
    %156 = arith.subi %106, %155 : vector<1x256xi32>
    %c0_i32_49 = arith.constant 0 : i32
    %157 = vector.broadcast %c0_i32_49 : i32 to vector<1x256xi32>
    %158 = arith.addi %156, %157 : vector<1x256xi32>
    %c0_i32_50 = arith.constant 0 : i32
    %c7_i32_51 = arith.constant 7 : i32
    %159 = vector.broadcast %c0_i32_50 : i32 to vector<1x256xi32>
    %160 = arith.maxsi %159, %158 : vector<1x256xi32>
    %161 = vector.broadcast %c7_i32_51 : i32 to vector<1x256xi32>
    %162 = arith.minsi %161, %160 : vector<1x256xi32>
    %c1_i32_52 = arith.constant 1 : i32
    %163 = vector.broadcast %c1_i32_52 : i32 to vector<1x256xi32>
    %164 = arith.subi %106, %163 : vector<1x256xi32>
    %c1_i32_53 = arith.constant 1 : i32
    %165 = vector.broadcast %c1_i32_53 : i32 to vector<1x256xi32>
    %166 = arith.addi %164, %165 : vector<1x256xi32>
    %c0_i32_54 = arith.constant 0 : i32
    %c7_i32_55 = arith.constant 7 : i32
    %167 = vector.broadcast %c0_i32_54 : i32 to vector<1x256xi32>
    %168 = arith.maxsi %167, %166 : vector<1x256xi32>
    %169 = vector.broadcast %c7_i32_55 : i32 to vector<1x256xi32>
    %170 = arith.minsi %169, %168 : vector<1x256xi32>
    %c1_i32_56 = arith.constant 1 : i32
    %171 = vector.broadcast %c1_i32_56 : i32 to vector<1x256xi32>
    %172 = arith.subi %106, %171 : vector<1x256xi32>
    %c2_i32_57 = arith.constant 2 : i32
    %173 = vector.broadcast %c2_i32_57 : i32 to vector<1x256xi32>
    %174 = arith.addi %172, %173 : vector<1x256xi32>
    %c0_i32_58 = arith.constant 0 : i32
    %c7_i32_59 = arith.constant 7 : i32
    %175 = vector.broadcast %c0_i32_58 : i32 to vector<1x256xi32>
    %176 = arith.maxsi %175, %174 : vector<1x256xi32>
    %177 = vector.broadcast %c7_i32_59 : i32 to vector<1x256xi32>
    %178 = arith.minsi %177, %176 : vector<1x256xi32>
    %c1_i32_60 = arith.constant 1 : i32
    %179 = vector.broadcast %c1_i32_60 : i32 to vector<1x256xi32>
    %180 = arith.subi %106, %179 : vector<1x256xi32>
    %c3_i32_61 = arith.constant 3 : i32
    %181 = vector.broadcast %c3_i32_61 : i32 to vector<1x256xi32>
    %182 = arith.addi %180, %181 : vector<1x256xi32>
    %c0_i32_62 = arith.constant 0 : i32
    %c7_i32_63 = arith.constant 7 : i32
    %183 = vector.broadcast %c0_i32_62 : i32 to vector<1x256xi32>
    %184 = arith.maxsi %183, %182 : vector<1x256xi32>
    %185 = vector.broadcast %c7_i32_63 : i32 to vector<1x256xi32>
    %186 = arith.minsi %185, %184 : vector<1x256xi32>
    %187 = tpu.iota {dimensions = array<i32: 0>} : vector<8x256xi32>
    %cst_64 = arith.constant 0.000000e+00 : f32
    %188 = vector.broadcast %cst_64 : f32 to vector<8x256xf32>
    %189 = vector.broadcast %162 : vector<1x256xi32> to vector<8x256xi32>
    %190 = arith.cmpi eq, %187, %189 : vector<8x256xi32>
    %191 = vector.broadcast %124 : vector<1x256xf32> to vector<8x256xf32>
    %192 = arith.addf %188, %191 : vector<8x256xf32>
    %193 = arith.select %190, %192, %188 : vector<8x256xi1>, vector<8x256xf32>
    %194 = vector.broadcast %170 : vector<1x256xi32> to vector<8x256xi32>
    %195 = arith.cmpi eq, %187, %194 : vector<8x256xi32>
    %196 = vector.broadcast %134 : vector<1x256xf32> to vector<8x256xf32>
    %197 = arith.addf %193, %196 : vector<8x256xf32>
    %198 = arith.select %195, %197, %193 : vector<8x256xi1>, vector<8x256xf32>
    %199 = vector.broadcast %178 : vector<1x256xi32> to vector<8x256xi32>
    %200 = arith.cmpi eq, %187, %199 : vector<8x256xi32>
    %201 = vector.broadcast %144 : vector<1x256xf32> to vector<8x256xf32>
    %202 = arith.addf %198, %201 : vector<8x256xf32>
    %203 = arith.select %200, %202, %198 : vector<8x256xi1>, vector<8x256xf32>
    %204 = vector.broadcast %186 : vector<1x256xi32> to vector<8x256xi32>
    %205 = arith.cmpi eq, %187, %204 : vector<8x256xi32>
    %206 = vector.broadcast %154 : vector<1x256xf32> to vector<8x256xf32>
    %207 = arith.addf %203, %206 : vector<8x256xf32>
    %208 = arith.select %205, %207, %203 : vector<8x256xi1>, vector<8x256xf32>
    %209 = vector.shape_cast %104 : vector<8x256xf32> to vector<8x1x256xf32>
    %210 = vector.shape_cast %208 : vector<8x256xf32> to vector<1x8x256xf32>
    %211 = vector.broadcast %209 : vector<8x1x256xf32> to vector<8x8x256xf32>
    %212 = vector.broadcast %210 : vector<1x8x256xf32> to vector<8x8x256xf32>
    %213 = arith.mulf %211, %212 : vector<8x8x256xf32>
    %214 = vector.shape_cast %213 : vector<8x8x256xf32> to vector<64x256xf32>
    %215 = vector.extract_strided_slice %0 {offsets = [0, 0], sizes = [1, 256], strides = [1, 1]} : vector<8x256xf32> to vector<1x256xf32>
    %216 = arith.fptosi %215 : vector<1x256xf32> to vector<1x256xi32>
    %217 = arith.sitofp %216 : vector<1x256xi32> to vector<1x256xf32>
    %218 = arith.subf %215, %217 : vector<1x256xf32>
    %cst_65 = arith.constant 0.000000e+00 : f32
    %cst_66 = arith.constant 1.000000e+00 : f32
    %219 = vector.broadcast %cst_65 : f32 to vector<1x256xf32>
    %220 = arith.maximumf %219, %218 : vector<1x256xf32>
    %221 = vector.broadcast %cst_66 : f32 to vector<1x256xf32>
    %222 = arith.minimumf %221, %220 : vector<1x256xf32>
    %223 = arith.mulf %222, %222 : vector<1x256xf32>
    %224 = arith.mulf %223, %222 : vector<1x256xf32>
    %cst_67 = arith.constant -5.000000e-01 : f32
    %225 = vector.broadcast %cst_67 : f32 to vector<1x256xf32>
    %226 = arith.mulf %224, %225 : vector<1x256xf32>
    %cst_68 = arith.constant 1.000000e+00 : f32
    %227 = vector.broadcast %cst_68 : f32 to vector<1x256xf32>
    %228 = arith.mulf %223, %227 : vector<1x256xf32>
    %229 = arith.addf %226, %228 : vector<1x256xf32>
    %cst_69 = arith.constant -5.000000e-01 : f32
    %230 = vector.broadcast %cst_69 : f32 to vector<1x256xf32>
    %231 = arith.mulf %222, %230 : vector<1x256xf32>
    %232 = arith.addf %229, %231 : vector<1x256xf32>
    %cst_70 = arith.constant 0.000000e+00 : f32
    %233 = vector.broadcast %cst_70 : f32 to vector<1x256xf32>
    %234 = arith.addf %232, %233 : vector<1x256xf32>
    %cst_71 = arith.constant 1.500000e+00 : f32
    %235 = vector.broadcast %cst_71 : f32 to vector<1x256xf32>
    %236 = arith.mulf %224, %235 : vector<1x256xf32>
    %cst_72 = arith.constant -2.500000e+00 : f32
    %237 = vector.broadcast %cst_72 : f32 to vector<1x256xf32>
    %238 = arith.mulf %223, %237 : vector<1x256xf32>
    %239 = arith.addf %236, %238 : vector<1x256xf32>
    %cst_73 = arith.constant 0.000000e+00 : f32
    %240 = vector.broadcast %cst_73 : f32 to vector<1x256xf32>
    %241 = arith.mulf %222, %240 : vector<1x256xf32>
    %242 = arith.addf %239, %241 : vector<1x256xf32>
    %cst_74 = arith.constant 1.000000e+00 : f32
    %243 = vector.broadcast %cst_74 : f32 to vector<1x256xf32>
    %244 = arith.addf %242, %243 : vector<1x256xf32>
    %cst_75 = arith.constant -1.500000e+00 : f32
    %245 = vector.broadcast %cst_75 : f32 to vector<1x256xf32>
    %246 = arith.mulf %224, %245 : vector<1x256xf32>
    %cst_76 = arith.constant 2.000000e+00 : f32
    %247 = vector.broadcast %cst_76 : f32 to vector<1x256xf32>
    %248 = arith.mulf %223, %247 : vector<1x256xf32>
    %249 = arith.addf %246, %248 : vector<1x256xf32>
    %cst_77 = arith.constant 5.000000e-01 : f32
    %250 = vector.broadcast %cst_77 : f32 to vector<1x256xf32>
    %251 = arith.mulf %222, %250 : vector<1x256xf32>
    %252 = arith.addf %249, %251 : vector<1x256xf32>
    %cst_78 = arith.constant 0.000000e+00 : f32
    %253 = vector.broadcast %cst_78 : f32 to vector<1x256xf32>
    %254 = arith.addf %252, %253 : vector<1x256xf32>
    %cst_79 = arith.constant 5.000000e-01 : f32
    %255 = vector.broadcast %cst_79 : f32 to vector<1x256xf32>
    %256 = arith.mulf %224, %255 : vector<1x256xf32>
    %cst_80 = arith.constant -5.000000e-01 : f32
    %257 = vector.broadcast %cst_80 : f32 to vector<1x256xf32>
    %258 = arith.mulf %223, %257 : vector<1x256xf32>
    %259 = arith.addf %256, %258 : vector<1x256xf32>
    %cst_81 = arith.constant 0.000000e+00 : f32
    %260 = vector.broadcast %cst_81 : f32 to vector<1x256xf32>
    %261 = arith.mulf %222, %260 : vector<1x256xf32>
    %262 = arith.addf %259, %261 : vector<1x256xf32>
    %cst_82 = arith.constant 0.000000e+00 : f32
    %263 = vector.broadcast %cst_82 : f32 to vector<1x256xf32>
    %264 = arith.addf %262, %263 : vector<1x256xf32>
    %c1_i32_83 = arith.constant 1 : i32
    %265 = vector.broadcast %c1_i32_83 : i32 to vector<1x256xi32>
    %266 = arith.subi %216, %265 : vector<1x256xi32>
    %c0_i32_84 = arith.constant 0 : i32
    %267 = vector.broadcast %c0_i32_84 : i32 to vector<1x256xi32>
    %268 = arith.addi %266, %267 : vector<1x256xi32>
    %c0_i32_85 = arith.constant 0 : i32
    %c7_i32_86 = arith.constant 7 : i32
    %269 = vector.broadcast %c0_i32_85 : i32 to vector<1x256xi32>
    %270 = arith.maxsi %269, %268 : vector<1x256xi32>
    %271 = vector.broadcast %c7_i32_86 : i32 to vector<1x256xi32>
    %272 = arith.minsi %271, %270 : vector<1x256xi32>
    %c1_i32_87 = arith.constant 1 : i32
    %273 = vector.broadcast %c1_i32_87 : i32 to vector<1x256xi32>
    %274 = arith.subi %216, %273 : vector<1x256xi32>
    %c1_i32_88 = arith.constant 1 : i32
    %275 = vector.broadcast %c1_i32_88 : i32 to vector<1x256xi32>
    %276 = arith.addi %274, %275 : vector<1x256xi32>
    %c0_i32_89 = arith.constant 0 : i32
    %c7_i32_90 = arith.constant 7 : i32
    %277 = vector.broadcast %c0_i32_89 : i32 to vector<1x256xi32>
    %278 = arith.maxsi %277, %276 : vector<1x256xi32>
    %279 = vector.broadcast %c7_i32_90 : i32 to vector<1x256xi32>
    %280 = arith.minsi %279, %278 : vector<1x256xi32>
    %c1_i32_91 = arith.constant 1 : i32
    %281 = vector.broadcast %c1_i32_91 : i32 to vector<1x256xi32>
    %282 = arith.subi %216, %281 : vector<1x256xi32>
    %c2_i32_92 = arith.constant 2 : i32
    %283 = vector.broadcast %c2_i32_92 : i32 to vector<1x256xi32>
    %284 = arith.addi %282, %283 : vector<1x256xi32>
    %c0_i32_93 = arith.constant 0 : i32
    %c7_i32_94 = arith.constant 7 : i32
    %285 = vector.broadcast %c0_i32_93 : i32 to vector<1x256xi32>
    %286 = arith.maxsi %285, %284 : vector<1x256xi32>
    %287 = vector.broadcast %c7_i32_94 : i32 to vector<1x256xi32>
    %288 = arith.minsi %287, %286 : vector<1x256xi32>
    %c1_i32_95 = arith.constant 1 : i32
    %289 = vector.broadcast %c1_i32_95 : i32 to vector<1x256xi32>
    %290 = arith.subi %216, %289 : vector<1x256xi32>
    %c3_i32_96 = arith.constant 3 : i32
    %291 = vector.broadcast %c3_i32_96 : i32 to vector<1x256xi32>
    %292 = arith.addi %290, %291 : vector<1x256xi32>
    %c0_i32_97 = arith.constant 0 : i32
    %c7_i32_98 = arith.constant 7 : i32
    %293 = vector.broadcast %c0_i32_97 : i32 to vector<1x256xi32>
    %294 = arith.maxsi %293, %292 : vector<1x256xi32>
    %295 = vector.broadcast %c7_i32_98 : i32 to vector<1x256xi32>
    %296 = arith.minsi %295, %294 : vector<1x256xi32>
    %cst_99 = arith.constant 0.000000e+00 : f32
    %297 = vector.broadcast %cst_99 : f32 to vector<8x256xf32>
    %c0_i32_100 = arith.constant 0 : i32
    %298 = arith.index_cast %c0_i32_100 : i32 to index
    %c0_101 = arith.constant 0 : index
    %c0_102 = arith.constant 0 : index
    %299 = vector.load %arg2[%298, %c0_101, %c0_102] : memref<8x8x64xf32, #tpu.memory_space<vmem>>, vector<1x8x64xf32>
    %300 = vector.shape_cast %299 : vector<1x8x64xf32> to vector<8x64xf32>
    %cst_103 = arith.constant dense<0.000000e+00> : vector<8x256xf32>
    %301 = tpu.matmul %300, %214, %cst_103 {dimension_numbers = #tpu.dot_dimension_numbers<[1], [0], [0], [1], [0, 0, 1, 1], [], []>} : vector<8x64xf32>, vector<64x256xf32>, vector<8x256xf32> -> vector<8x256xf32>
    %cst_104 = arith.constant 0.000000e+00 : f32
    %302 = vector.broadcast %cst_104 : f32 to vector<1x256xf32>
    %303 = vector.broadcast %c0_i32_100 : i32 to vector<1x256xi32>
    %304 = arith.cmpi eq, %272, %303 : vector<1x256xi32>
    %305 = arith.addf %302, %234 : vector<1x256xf32>
    %306 = arith.select %304, %305, %302 : vector<1x256xi1>, vector<1x256xf32>
    %307 = vector.broadcast %c0_i32_100 : i32 to vector<1x256xi32>
    %308 = arith.cmpi eq, %280, %307 : vector<1x256xi32>
    %309 = arith.addf %306, %244 : vector<1x256xf32>
    %310 = arith.select %308, %309, %306 : vector<1x256xi1>, vector<1x256xf32>
    %311 = vector.broadcast %c0_i32_100 : i32 to vector<1x256xi32>
    %312 = arith.cmpi eq, %288, %311 : vector<1x256xi32>
    %313 = arith.addf %310, %254 : vector<1x256xf32>
    %314 = arith.select %312, %313, %310 : vector<1x256xi1>, vector<1x256xf32>
    %315 = vector.broadcast %c0_i32_100 : i32 to vector<1x256xi32>
    %316 = arith.cmpi eq, %296, %315 : vector<1x256xi32>
    %317 = arith.addf %314, %264 : vector<1x256xf32>
    %318 = arith.select %316, %317, %314 : vector<1x256xi1>, vector<1x256xf32>
    %319 = vector.broadcast %318 : vector<1x256xf32> to vector<8x256xf32>
    %320 = arith.mulf %301, %319 : vector<8x256xf32>
    %321 = arith.addf %297, %320 : vector<8x256xf32>
    %c1_i32_105 = arith.constant 1 : i32
    %322 = arith.index_cast %c1_i32_105 : i32 to index
    %c0_106 = arith.constant 0 : index
    %c0_107 = arith.constant 0 : index
    %323 = vector.load %arg2[%322, %c0_106, %c0_107] : memref<8x8x64xf32, #tpu.memory_space<vmem>>, vector<1x8x64xf32>
    %324 = vector.shape_cast %323 : vector<1x8x64xf32> to vector<8x64xf32>
    %cst_108 = arith.constant dense<0.000000e+00> : vector<8x256xf32>
    %325 = tpu.matmul %324, %214, %cst_108 {dimension_numbers = #tpu.dot_dimension_numbers<[1], [0], [0], [1], [0, 0, 1, 1], [], []>} : vector<8x64xf32>, vector<64x256xf32>, vector<8x256xf32> -> vector<8x256xf32>
    %cst_109 = arith.constant 0.000000e+00 : f32
    %326 = vector.broadcast %cst_109 : f32 to vector<1x256xf32>
    %327 = vector.broadcast %c1_i32_105 : i32 to vector<1x256xi32>
    %328 = arith.cmpi eq, %272, %327 : vector<1x256xi32>
    %329 = arith.addf %326, %234 : vector<1x256xf32>
    %330 = arith.select %328, %329, %326 : vector<1x256xi1>, vector<1x256xf32>
    %331 = vector.broadcast %c1_i32_105 : i32 to vector<1x256xi32>
    %332 = arith.cmpi eq, %280, %331 : vector<1x256xi32>
    %333 = arith.addf %330, %244 : vector<1x256xf32>
    %334 = arith.select %332, %333, %330 : vector<1x256xi1>, vector<1x256xf32>
    %335 = vector.broadcast %c1_i32_105 : i32 to vector<1x256xi32>
    %336 = arith.cmpi eq, %288, %335 : vector<1x256xi32>
    %337 = arith.addf %334, %254 : vector<1x256xf32>
    %338 = arith.select %336, %337, %334 : vector<1x256xi1>, vector<1x256xf32>
    %339 = vector.broadcast %c1_i32_105 : i32 to vector<1x256xi32>
    %340 = arith.cmpi eq, %296, %339 : vector<1x256xi32>
    %341 = arith.addf %338, %264 : vector<1x256xf32>
    %342 = arith.select %340, %341, %338 : vector<1x256xi1>, vector<1x256xf32>
    %343 = vector.broadcast %342 : vector<1x256xf32> to vector<8x256xf32>
    %344 = arith.mulf %325, %343 : vector<8x256xf32>
    %345 = arith.addf %321, %344 : vector<8x256xf32>
    %c2_i32_110 = arith.constant 2 : i32
    %346 = arith.index_cast %c2_i32_110 : i32 to index
    %c0_111 = arith.constant 0 : index
    %c0_112 = arith.constant 0 : index
    %347 = vector.load %arg2[%346, %c0_111, %c0_112] : memref<8x8x64xf32, #tpu.memory_space<vmem>>, vector<1x8x64xf32>
    %348 = vector.shape_cast %347 : vector<1x8x64xf32> to vector<8x64xf32>
    %cst_113 = arith.constant dense<0.000000e+00> : vector<8x256xf32>
    %349 = tpu.matmul %348, %214, %cst_113 {dimension_numbers = #tpu.dot_dimension_numbers<[1], [0], [0], [1], [0, 0, 1, 1], [], []>} : vector<8x64xf32>, vector<64x256xf32>, vector<8x256xf32> -> vector<8x256xf32>
    %cst_114 = arith.constant 0.000000e+00 : f32
    %350 = vector.broadcast %cst_114 : f32 to vector<1x256xf32>
    %351 = vector.broadcast %c2_i32_110 : i32 to vector<1x256xi32>
    %352 = arith.cmpi eq, %272, %351 : vector<1x256xi32>
    %353 = arith.addf %350, %234 : vector<1x256xf32>
    %354 = arith.select %352, %353, %350 : vector<1x256xi1>, vector<1x256xf32>
    %355 = vector.broadcast %c2_i32_110 : i32 to vector<1x256xi32>
    %356 = arith.cmpi eq, %280, %355 : vector<1x256xi32>
    %357 = arith.addf %354, %244 : vector<1x256xf32>
    %358 = arith.select %356, %357, %354 : vector<1x256xi1>, vector<1x256xf32>
    %359 = vector.broadcast %c2_i32_110 : i32 to vector<1x256xi32>
    %360 = arith.cmpi eq, %288, %359 : vector<1x256xi32>
    %361 = arith.addf %358, %254 : vector<1x256xf32>
    %362 = arith.select %360, %361, %358 : vector<1x256xi1>, vector<1x256xf32>
    %363 = vector.broadcast %c2_i32_110 : i32 to vector<1x256xi32>
    %364 = arith.cmpi eq, %296, %363 : vector<1x256xi32>
    %365 = arith.addf %362, %264 : vector<1x256xf32>
    %366 = arith.select %364, %365, %362 : vector<1x256xi1>, vector<1x256xf32>
    %367 = vector.broadcast %366 : vector<1x256xf32> to vector<8x256xf32>
    %368 = arith.mulf %349, %367 : vector<8x256xf32>
    %369 = arith.addf %345, %368 : vector<8x256xf32>
    %c3_i32_115 = arith.constant 3 : i32
    %370 = arith.index_cast %c3_i32_115 : i32 to index
    %c0_116 = arith.constant 0 : index
    %c0_117 = arith.constant 0 : index
    %371 = vector.load %arg2[%370, %c0_116, %c0_117] : memref<8x8x64xf32, #tpu.memory_space<vmem>>, vector<1x8x64xf32>
    %372 = vector.shape_cast %371 : vector<1x8x64xf32> to vector<8x64xf32>
    %cst_118 = arith.constant dense<0.000000e+00> : vector<8x256xf32>
    %373 = tpu.matmul %372, %214, %cst_118 {dimension_numbers = #tpu.dot_dimension_numbers<[1], [0], [0], [1], [0, 0, 1, 1], [], []>} : vector<8x64xf32>, vector<64x256xf32>, vector<8x256xf32> -> vector<8x256xf32>
    %cst_119 = arith.constant 0.000000e+00 : f32
    %374 = vector.broadcast %cst_119 : f32 to vector<1x256xf32>
    %375 = vector.broadcast %c3_i32_115 : i32 to vector<1x256xi32>
    %376 = arith.cmpi eq, %272, %375 : vector<1x256xi32>
    %377 = arith.addf %374, %234 : vector<1x256xf32>
    %378 = arith.select %376, %377, %374 : vector<1x256xi1>, vector<1x256xf32>
    %379 = vector.broadcast %c3_i32_115 : i32 to vector<1x256xi32>
    %380 = arith.cmpi eq, %280, %379 : vector<1x256xi32>
    %381 = arith.addf %378, %244 : vector<1x256xf32>
    %382 = arith.select %380, %381, %378 : vector<1x256xi1>, vector<1x256xf32>
    %383 = vector.broadcast %c3_i32_115 : i32 to vector<1x256xi32>
    %384 = arith.cmpi eq, %288, %383 : vector<1x256xi32>
    %385 = arith.addf %382, %254 : vector<1x256xf32>
    %386 = arith.select %384, %385, %382 : vector<1x256xi1>, vector<1x256xf32>
    %387 = vector.broadcast %c3_i32_115 : i32 to vector<1x256xi32>
    %388 = arith.cmpi eq, %296, %387 : vector<1x256xi32>
    %389 = arith.addf %386, %264 : vector<1x256xf32>
    %390 = arith.select %388, %389, %386 : vector<1x256xi1>, vector<1x256xf32>
    %391 = vector.broadcast %390 : vector<1x256xf32> to vector<8x256xf32>
    %392 = arith.mulf %373, %391 : vector<8x256xf32>
    %393 = arith.addf %369, %392 : vector<8x256xf32>
    %c4_i32 = arith.constant 4 : i32
    %394 = arith.index_cast %c4_i32 : i32 to index
    %c0_120 = arith.constant 0 : index
    %c0_121 = arith.constant 0 : index
    %395 = vector.load %arg2[%394, %c0_120, %c0_121] : memref<8x8x64xf32, #tpu.memory_space<vmem>>, vector<1x8x64xf32>
    %396 = vector.shape_cast %395 : vector<1x8x64xf32> to vector<8x64xf32>
    %cst_122 = arith.constant dense<0.000000e+00> : vector<8x256xf32>
    %397 = tpu.matmul %396, %214, %cst_122 {dimension_numbers = #tpu.dot_dimension_numbers<[1], [0], [0], [1], [0, 0, 1, 1], [], []>} : vector<8x64xf32>, vector<64x256xf32>, vector<8x256xf32> -> vector<8x256xf32>
    %cst_123 = arith.constant 0.000000e+00 : f32
    %398 = vector.broadcast %cst_123 : f32 to vector<1x256xf32>
    %399 = vector.broadcast %c4_i32 : i32 to vector<1x256xi32>
    %400 = arith.cmpi eq, %272, %399 : vector<1x256xi32>
    %401 = arith.addf %398, %234 : vector<1x256xf32>
    %402 = arith.select %400, %401, %398 : vector<1x256xi1>, vector<1x256xf32>
    %403 = vector.broadcast %c4_i32 : i32 to vector<1x256xi32>
    %404 = arith.cmpi eq, %280, %403 : vector<1x256xi32>
    %405 = arith.addf %402, %244 : vector<1x256xf32>
    %406 = arith.select %404, %405, %402 : vector<1x256xi1>, vector<1x256xf32>
    %407 = vector.broadcast %c4_i32 : i32 to vector<1x256xi32>
    %408 = arith.cmpi eq, %288, %407 : vector<1x256xi32>
    %409 = arith.addf %406, %254 : vector<1x256xf32>
    %410 = arith.select %408, %409, %406 : vector<1x256xi1>, vector<1x256xf32>
    %411 = vector.broadcast %c4_i32 : i32 to vector<1x256xi32>
    %412 = arith.cmpi eq, %296, %411 : vector<1x256xi32>
    %413 = arith.addf %410, %264 : vector<1x256xf32>
    %414 = arith.select %412, %413, %410 : vector<1x256xi1>, vector<1x256xf32>
    %415 = vector.broadcast %414 : vector<1x256xf32> to vector<8x256xf32>
    %416 = arith.mulf %397, %415 : vector<8x256xf32>
    %417 = arith.addf %393, %416 : vector<8x256xf32>
    %c5_i32 = arith.constant 5 : i32
    %418 = arith.index_cast %c5_i32 : i32 to index
    %c0_124 = arith.constant 0 : index
    %c0_125 = arith.constant 0 : index
    %419 = vector.load %arg2[%418, %c0_124, %c0_125] : memref<8x8x64xf32, #tpu.memory_space<vmem>>, vector<1x8x64xf32>
    %420 = vector.shape_cast %419 : vector<1x8x64xf32> to vector<8x64xf32>
    %cst_126 = arith.constant dense<0.000000e+00> : vector<8x256xf32>
    %421 = tpu.matmul %420, %214, %cst_126 {dimension_numbers = #tpu.dot_dimension_numbers<[1], [0], [0], [1], [0, 0, 1, 1], [], []>} : vector<8x64xf32>, vector<64x256xf32>, vector<8x256xf32> -> vector<8x256xf32>
    %cst_127 = arith.constant 0.000000e+00 : f32
    %422 = vector.broadcast %cst_127 : f32 to vector<1x256xf32>
    %423 = vector.broadcast %c5_i32 : i32 to vector<1x256xi32>
    %424 = arith.cmpi eq, %272, %423 : vector<1x256xi32>
    %425 = arith.addf %422, %234 : vector<1x256xf32>
    %426 = arith.select %424, %425, %422 : vector<1x256xi1>, vector<1x256xf32>
    %427 = vector.broadcast %c5_i32 : i32 to vector<1x256xi32>
    %428 = arith.cmpi eq, %280, %427 : vector<1x256xi32>
    %429 = arith.addf %426, %244 : vector<1x256xf32>
    %430 = arith.select %428, %429, %426 : vector<1x256xi1>, vector<1x256xf32>
    %431 = vector.broadcast %c5_i32 : i32 to vector<1x256xi32>
    %432 = arith.cmpi eq, %288, %431 : vector<1x256xi32>
    %433 = arith.addf %430, %254 : vector<1x256xf32>
    %434 = arith.select %432, %433, %430 : vector<1x256xi1>, vector<1x256xf32>
    %435 = vector.broadcast %c5_i32 : i32 to vector<1x256xi32>
    %436 = arith.cmpi eq, %296, %435 : vector<1x256xi32>
    %437 = arith.addf %434, %264 : vector<1x256xf32>
    %438 = arith.select %436, %437, %434 : vector<1x256xi1>, vector<1x256xf32>
    %439 = vector.broadcast %438 : vector<1x256xf32> to vector<8x256xf32>
    %440 = arith.mulf %421, %439 : vector<8x256xf32>
    %441 = arith.addf %417, %440 : vector<8x256xf32>
    %c6_i32 = arith.constant 6 : i32
    %442 = arith.index_cast %c6_i32 : i32 to index
    %c0_128 = arith.constant 0 : index
    %c0_129 = arith.constant 0 : index
    %443 = vector.load %arg2[%442, %c0_128, %c0_129] : memref<8x8x64xf32, #tpu.memory_space<vmem>>, vector<1x8x64xf32>
    %444 = vector.shape_cast %443 : vector<1x8x64xf32> to vector<8x64xf32>
    %cst_130 = arith.constant dense<0.000000e+00> : vector<8x256xf32>
    %445 = tpu.matmul %444, %214, %cst_130 {dimension_numbers = #tpu.dot_dimension_numbers<[1], [0], [0], [1], [0, 0, 1, 1], [], []>} : vector<8x64xf32>, vector<64x256xf32>, vector<8x256xf32> -> vector<8x256xf32>
    %cst_131 = arith.constant 0.000000e+00 : f32
    %446 = vector.broadcast %cst_131 : f32 to vector<1x256xf32>
    %447 = vector.broadcast %c6_i32 : i32 to vector<1x256xi32>
    %448 = arith.cmpi eq, %272, %447 : vector<1x256xi32>
    %449 = arith.addf %446, %234 : vector<1x256xf32>
    %450 = arith.select %448, %449, %446 : vector<1x256xi1>, vector<1x256xf32>
    %451 = vector.broadcast %c6_i32 : i32 to vector<1x256xi32>
    %452 = arith.cmpi eq, %280, %451 : vector<1x256xi32>
    %453 = arith.addf %450, %244 : vector<1x256xf32>
    %454 = arith.select %452, %453, %450 : vector<1x256xi1>, vector<1x256xf32>
    %455 = vector.broadcast %c6_i32 : i32 to vector<1x256xi32>
    %456 = arith.cmpi eq, %288, %455 : vector<1x256xi32>
    %457 = arith.addf %454, %254 : vector<1x256xf32>
    %458 = arith.select %456, %457, %454 : vector<1x256xi1>, vector<1x256xf32>
    %459 = vector.broadcast %c6_i32 : i32 to vector<1x256xi32>
    %460 = arith.cmpi eq, %296, %459 : vector<1x256xi32>
    %461 = arith.addf %458, %264 : vector<1x256xf32>
    %462 = arith.select %460, %461, %458 : vector<1x256xi1>, vector<1x256xf32>
    %463 = vector.broadcast %462 : vector<1x256xf32> to vector<8x256xf32>
    %464 = arith.mulf %445, %463 : vector<8x256xf32>
    %465 = arith.addf %441, %464 : vector<8x256xf32>
    %c7_i32_132 = arith.constant 7 : i32
    %466 = arith.index_cast %c7_i32_132 : i32 to index
    %c0_133 = arith.constant 0 : index
    %c0_134 = arith.constant 0 : index
    %467 = vector.load %arg2[%466, %c0_133, %c0_134] : memref<8x8x64xf32, #tpu.memory_space<vmem>>, vector<1x8x64xf32>
    %468 = vector.shape_cast %467 : vector<1x8x64xf32> to vector<8x64xf32>
    %cst_135 = arith.constant dense<0.000000e+00> : vector<8x256xf32>
    %469 = tpu.matmul %468, %214, %cst_135 {dimension_numbers = #tpu.dot_dimension_numbers<[1], [0], [0], [1], [0, 0, 1, 1], [], []>} : vector<8x64xf32>, vector<64x256xf32>, vector<8x256xf32> -> vector<8x256xf32>
    %cst_136 = arith.constant 0.000000e+00 : f32
    %470 = vector.broadcast %cst_136 : f32 to vector<1x256xf32>
    %471 = vector.broadcast %c7_i32_132 : i32 to vector<1x256xi32>
    %472 = arith.cmpi eq, %272, %471 : vector<1x256xi32>
    %473 = arith.addf %470, %234 : vector<1x256xf32>
    %474 = arith.select %472, %473, %470 : vector<1x256xi1>, vector<1x256xf32>
    %475 = vector.broadcast %c7_i32_132 : i32 to vector<1x256xi32>
    %476 = arith.cmpi eq, %280, %475 : vector<1x256xi32>
    %477 = arith.addf %474, %244 : vector<1x256xf32>
    %478 = arith.select %476, %477, %474 : vector<1x256xi1>, vector<1x256xf32>
    %479 = vector.broadcast %c7_i32_132 : i32 to vector<1x256xi32>
    %480 = arith.cmpi eq, %288, %479 : vector<1x256xi32>
    %481 = arith.addf %478, %254 : vector<1x256xf32>
    %482 = arith.select %480, %481, %478 : vector<1x256xi1>, vector<1x256xf32>
    %483 = vector.broadcast %c7_i32_132 : i32 to vector<1x256xi32>
    %484 = arith.cmpi eq, %296, %483 : vector<1x256xi32>
    %485 = arith.addf %482, %264 : vector<1x256xf32>
    %486 = arith.select %484, %485, %482 : vector<1x256xi1>, vector<1x256xf32>
    %487 = vector.broadcast %486 : vector<1x256xf32> to vector<8x256xf32>
    %488 = arith.mulf %469, %487 : vector<8x256xf32>
    %489 = arith.addf %465, %488 : vector<8x256xf32>
    %c8_i32 = arith.constant 8 : i32
    %c0_137 = arith.constant 0 : index
    %c0_138 = arith.constant 0 : index
    %490 = vector.load %arg3[%c0_137, %c0_138] : memref<8x256xf32, #tpu.memory_space<vmem>>, vector<8x256xf32>
    tpu.vector_store %arg3[%c0_137, %c0_138], %489 {strides = array<i32>} : memref<8x256xf32, #tpu.memory_space<vmem>>, vector<8x256xf32>,
    return
  }
  func.func @transform_0(%arg0: i32) -> (i32, i32) {
    %c0_i32 = arith.constant 0 : i32
    %c0_i32_0 = arith.constant 0 : i32
    return %c0_i32, %arg0 : i32, i32
  }
  func.func @transform_1(%arg0: i32) -> (i32, i32, i32) {
    %c0_i32 = arith.constant 0 : i32
    %c0_i32_0 = arith.constant 0 : i32
    %c0_i32_1 = arith.constant 0 : i32
    %c0_i32_2 = arith.constant 0 : i32
    return %c0_i32, %c0_i32_0, %c0_i32_1 : i32, i32, i32
  }
  func.func @transform_2(%arg0: i32) -> (i32, i32) {
    %c0_i32 = arith.constant 0 : i32
    %c0_i32_0 = arith.constant 0 : i32
    return %c0_i32, %arg0 : i32, i32
  }
}

</mosaic_0001>

<bundles_post_ra>
// kernel: tpu_custom_call.1
= control target key start
LH: loop header
LB: loop body
LE: loop exit
PB: predicated region body
PF: predicated region fallthrough
CT: control target
= control target key end

     0   :  { %7 = vsyncpa [#allocation3], 0  ;;  %s2029_s0 = inlined_call_operand.hbm [shape: f32[8,512], index: 0, kind: input, shape index: {}]   ;;  %s2030_s1 = inlined_call_operand.hbm [shape: f32[8,8,64], index: 1, kind: input, shape index: {}]   ;;  %s2031_s2 = inlined_call_operand.hbm [shape: f32[8,512], index: 2, kind: output, shape index: {}]  }
   0x1   :  { %9 = vsyncpa [#allocation3 + $0x1], 0 }
   0x2   :  { %10 = vsyncpa [#allocation6], 0 }
   0x3   :  { %11 = vsyncpa [#allocation4], 0 }
   0x4   :  { %13 = vsyncpa [#allocation4 + $0x1], 0  ;;  %s1375_s9 = smov 0   ;;  %s1377_s10 = smov 0  }
   0x5   :  { %s1379_s11 = smov 0   ;;  %s1381_s12 = smov 0  }
   0x6 LB: > { %s108_s15 = sshll.u32 %s2030_s1, 4  ;;  %s1399_s16 = sadd.s32 4294967295, %s1355_s12   ;;  %s1355_s12 = sphi %s1381_s12, %s2055_s12   ;;  %s1351_s11 = sphi %s1379_s11, %s2054_s11   ;;  %s1347_s10 = sphi %s1377_s10, %s2053_s10   ;;  %s1343_s9 = sphi %s1375_s9, %s2052_s9   ;;  %s109_s15 = int_to_ptr.hbm [resolvable:$true] %s108_s15 }
   0x7   : > { %p1121_p0 = scmp.ge.s32.totalorder %s1355_s12, 1  ;;  %p40_p1 = scmp.eq.s32.totalorder %s1399_s16, 0 }
   0x8   : > { %p97_p2 = scmp.lt.s32.totalorder %s1355_s12, 3  ;;  %s1357_s18 = smov [#allocation5]  }
   0x9   : > { %s110_s19 = sshll.u32 %s1357_s18, 4  ;;  %s1358_s20 = smov 128   ;;  %s111_s19 = int_to_ptr.vmem [resolvable:$true] %s110_s19 }
   0xa   : > { %p1404_p3 = pnand %p1121_p0, %p97_p2  ;;  %s1359_s21 = smov 8  }
   0xb   : > { %s1120_s22 = sadd.s32 4294967294, %s1355_s12   ;;  %s1415_s23 = sadd.s32 1, %s1355_s12  }
   0xc   : > { %p1174_p4 = pneg %p1404_p3  ;;  %s26_s24 = sadd.s32 1, %s1351_s11 }
   0xd   : > { %s23_s25 = ssub.s32 %s1355_s12, %s1415_s23  ;;  %p33_p7 = scmp.ne.s32.totalorder %s1351_s11, %s1347_s10 }
   0xe   : > { %p1175_p6 = pnand %p1174_p4, %p40_p1  ;;  %p24_p8 = scmp.eq.s32.totalorder %s23_s25, 0 }
   0xf   : > { %p34_p9 = scmp.eq.s32.totalorder %s1355_s12, 0  ;;  %p39_p10 = scmp.ne.s32.totalorder %s1347_s10, %s1343_s9 }
  0x10   : > { %1177 = dma.hbm_to_vmem [thread:$0]  (!%p1175_p6), %s109_s15, 1024, %s111_s19, [#allocation6], %s1358_s20, %s1358_s20, %s1359_s21  }
  0x11   : > { %p84_p11 = scmp.eq.s32.totalorder %s1399_s16, 1  ;;  %p1431_p12 = por %p40_p1, %p39_p10 }
  0x12   : > { %s1427_s26 = scalar_select %p24_p8, %s1351_s11, %s26_s24  }
  0x13   : > { %p1435_p13 = por %p84_p11, %p33_p7  ;;  %p90_p0 = scmp.eq.s32.totalorder %s1120_s22, 1 }
  0x14   : > { %p35_p2 = por %p34_p9, %p33_p7  ;;  %s124_s29 = sand.u32 1, %s1351_s11  }
  0x15   : > { %p1440_p4 = por %p90_p0, %p39_p10  ;;  %p1187_p6 = scmp.lt.s32.totalorder %s1355_s12, 2 }
  0x16   : > { %s1124_s3 = sshll.u32 %s124_s29, 4  ;;  %s1154_s4 = sshll.u32 %s1355_s12, 4 }
  0x17   : > { %s133_s7 = scalar_lea.hbm %s2029_s0, %s1154_s4  ;;  %s128_s13 = scalar_lea.vmem [#allocation2], %s1124_s3 }
  0x18   : > { %s135_s8 = sshll.u32 %s133_s7, 4  ;;  %s137_s14 = sshll.u32 %s128_s13, 4  ;;  %s136_s8 = int_to_ptr.hbm [resolvable:$true] %s135_s8  ;;  %s138_s14 = int_to_ptr.vmem [resolvable:$true] %s137_s14 }
  0x19   : > { %p1449_p8 = pnand %p1187_p6, %p35_p2  ;;  %s125_s18 = scalar_lea.sflag [#allocation3], %s124_s29 }
  0x1a   : > { %s1255_s19 = sshra.s32 %s136_s8, 4  ;;  %s1262_s24 = scalar_lea.hbm %s2029_s0, 32  ;;  %s1256_s19 = int_to_ptr.hbm [resolvable:$true] %s1255_s19 }
  0x1b   : > { %s1257_s20 = scalar_lea.hbm %s1256_s19, 16  ;;  %p1259_p9 = pneg %p1449_p8 }
  0x1c   : > { %p1258_p7 = scmp.ne.s32.totalorder %s1256_s19, %s1257_s20  ;;  %p1263_p0 = scmp.lt.s32.totalorder %s1256_s19, %s2029_s0 }
  0x1d   : > { %p1264_p2 = scmp.lt.s32.totalorder %s1262_s24, %s1257_s20 }
  0x1e   : > { %p1260_p10 = pnand %p1259_p9, %p1258_p7 }
  0x1f   : > { %p1265_p6 = por %p1264_p2, %p1263_p0 }
  0x20   : > { %p1261_p11 = pneg %p1260_p10 }
  0x22   : > { %p1266_p5 = pnand %p1265_p6, %p1261_p11 }
  0x24   : > { %1269 = shalt.err (!%p1266_p5)
}
  0x25   : > { %1181 = dma.hbm_to_vmem [thread:$0]  (!%p1449_p8), %s136_s8, 256, %s138_s14, %s125_s18  }
  0x26   : > { %146 = sbr.rel (%p1404_p3) target bundleno = 311 (0x137), region = 28  ;;  %s1466_s29 = sand.u32 (!%p1404_p3), 1, %s1347_s10  }
  0x27   : > { %s1128_s4 = sshll.u32 (!%p1404_p3), %s1466_s29, 4  ;;  %s149_s5 = scalar_lea.sflag (!%p1404_p3), [#allocation3], %s1466_s29 }
  0x28   : > { %s152_s6 = scalar_lea.vmem (!%p1404_p3), [#allocation2], %s1128_s4 }
  0x2b   : > { %1330 = dma.done.wait (%p1431_p12), %s149_s5, 256  }
  0x2c   : > { %1332 = vsyncadd (%p1431_p12), %s149_s5, 4294967040 }
  0x2d   : > { %1334 = dma.done.wait (%p40_p1), [#allocation6], 1024  }
  0x2e   : > { %1336 = vsyncadd (%p40_p1), [#allocation6], 4294966272  ;;  %v181_v0 = vld [vmem:[%s152_s6] sm:$0xff]  ;;  %v182_v1 = vld [vmem:[%s152_s6 + $0x8] sm:$0xff]  ;;  %v279_v6 = vlaneseq  ;;  %s1155_s17 = sshll.u32 %s1399_s16, 4  ;;  %s178_s16 = scalar_lea.vmem [#allocation7], %s1128_s4 }
  0x2f   : > { %vm1156_vm0 = vcmp.lt.s32.totalorder %v181_v0, 0  ;;  %v1157_v2 = vceil.f32 %v181_v0  ;;  %v1158_v3 = vfloor.f32 %v181_v0  ;;  %vm1161_vm1 = vcmp.lt.s32.totalorder %v182_v1, 0  ;;  %s1035_s8 = scalar_lea.hbm %s2031_s2, %s1155_s17  ;;  %s1037_s13 = sshll.u32 %s178_s16, 4  ;;  %s1038_s13 = int_to_ptr.vmem [resolvable:$true] %s1037_s13 }
  0x30   : > { %v1162_v4 = vceil.f32 %v182_v1  ;;  %v1163_v5 = vfloor.f32 %v182_v1  ;;  %v1480_v13 = vshrl.u32 %v279_v6, 7  ;;  %s1039_s14 = sshll.u32 %s1035_s8, 4  ;;  %s1024_s15 = scalar_lea.sflag [#allocation4], %s1466_s29  ;;  %s1040_s14 = int_to_ptr.hbm [resolvable:$true] %s1039_s14 }
  0x31   : > { %v1159_v7 = vsel %vm1156_vm0, %v1157_v2, %v1158_v3  ;;  %s1299_s18 = sshra.s32 %s1040_s14, 4  ;;  %s1305_s22 = scalar_lea.hbm %s2031_s2, 32  ;;  %s1300_s18 = int_to_ptr.hbm [resolvable:$true] %s1299_s18 }
  0x32   : > { %v1160_v8 = vcvt.f32.s32 %v1159_v7  ;;  %v1164_v9 = vsel %vm1161_vm1, %v1162_v4, %v1163_v5  ;;  %s1301_s19 = scalar_lea.hbm %s1300_s18, 16  ;;  %p1306_p12 = scmp.lt.s32.totalorder %s1300_s18, %s2031_s2 }
  0x33   : > { %v1165_v10 = vcvt.f32.s32 %v1164_v9  ;;  %p1302_p1 = scmp.ne.s32.totalorder %s1300_s18, %s1301_s19  ;;  %p1307_p8 = scmp.lt.s32.totalorder %s1305_s22, %s1301_s19 }
  0x34   : > { %v185_v11 = vcvt.s32.f32 %v1160_v8  ;;  %v1131_v12 = vadd.s32 4294967295, %v1160_v8  ;;  %vm251_vm2 = vcmp.gt.s32.totalorder %v1160_v8, 0 }
  0x35   : > { %v186_v14 = vcvt.s32.f32 %v1165_v10  ;;  %v1132_v15 = vadd.s32 4294967295, %v1165_v10  ;;  %v252_v16 = vsel %vm251_vm2, %v1160_v8, 0  ;;  %vm253_vm3 = vcmp.gt.s32.totalorder %v1165_v10, 0  ;;  %p1303_p3 = pnand %p1302_p1, %p1435_p13  ;;  %p1308_p7 = por %p1307_p8, %p1306_p12 }
  0x36   : > { %v187_v17 = vsub.f32 %v181_v0, %v185_v11  ;;  %vm243_vm4 = vcmp.gt.s32.totalorder %v1131_v12, 0  ;;  %v254_v18 = vsel %vm253_vm3, %v1165_v10, 0  ;;  %vm255_vm5 = vcmp.lt.s32.totalorder %v252_v16, 7 }
  0x37   : > { %v188_v19 = vsub.f32 %v182_v1, %v186_v14  ;;  %v244_v20 = vsel %vm243_vm4, %v1131_v12, 0  ;;  %vm245_vm6 = vcmp.gt.s32.totalorder %v1132_v15, 0  ;;  %v1482_v21 = vsel %vm255_vm5, %v252_v16, 7  ;;  %p1304_p5 = pneg %p1303_p3 }
  0x38   : > { %v189_v22 = vmax.f32 %v187_v17, 0.0  ;;  %v246_v23 = vsel %vm245_vm6, %v1132_v15, 0  ;;  %vm247_vm7 = vcmp.lt.s32.totalorder %v244_v20, 7  ;;  %vm257_vm8 = vcmp.lt.s32.totalorder %v254_v18, 7 }
  0x39   : > { %v190_v24 = vmax.f32 %v188_v19, 0.0  ;;  %v1484_v25 = vsel %vm247_vm7, %v244_v20, 7  ;;  %vm249_vm9 = vcmp.lt.s32.totalorder %v246_v23, 7  ;;  %v1486_v26 = vsel %vm257_vm8, %v254_v18, 7  ;;  %p1309_p9 = pnand %p1308_p7, %p1304_p5 }
  0x3a   : > { %v191_v27 = vmin.f32 %v189_v22, 1.0  ;;  %v1488_v28 = vsel %vm249_vm9, %v246_v23, 7  ;;  %v259_v29 = vadd.s32 2, %v1131_v12  ;;  %v260_v30 = vadd.s32 2, %v1132_v15 }
  0x3b   : > { %v192_v31 = vmin.f32 %v190_v24, 1.0  ;;  %v269_v32 = vadd.s32 3, %v1131_v12  ;;  %v270_v33 = vadd.s32 3, %v1132_v15  ;;  %v281_v34 = vperm.slane %v1484_v25, 1 }
  0x3c   : > { %v193_v35 = vmul.f32 %v191_v27, %v191_v27  ;;  %v201_v36 = vmul.f32 -0.5, %v191_v27  ;;  %v213_v37 = vmul.f32 0.0, %v191_v27  ;;  %v225_v38 = vmul.f32 0.5, %v191_v27 }
  0x3d   : > { %v194_v39 = vmul.f32 %v192_v31, %v192_v31  ;;  %v202_v40 = vmul.f32 -0.5, %v192_v31  ;;  %v214_v41 = vmul.f32 0.0, %v192_v31  ;;  %v226_v42 = vmul.f32 0.5, %v192_v31 }
  0x3e   : > { %v195_v43 = vmul.f32 %v193_v35, %v191_v27  ;;  %v209_v44 = vmul.f32 -2.5, %v193_v35  ;;  %v221_v45 = vmul.f32 2.0, %v193_v35  ;;  %v233_v46 = vmul.f32 -0.5, %v193_v35 }
  0x3f   : > { %v196_v47 = vmul.f32 %v194_v39, %v192_v31  ;;  %v210_v48 = vmul.f32 -2.5, %v194_v39  ;;  %v222_v49 = vmul.f32 2.0, %v194_v39  ;;  %v234_v50 = vmul.f32 -0.5, %v194_v39 }
  0x40   : > { %v197_v51 = vmul.f32 -0.5, %v195_v43  ;;  %v207_v52 = vmul.f32 1.5, %v195_v43  ;;  %v219_v53 = vmul.f32 -1.5, %v195_v43  ;;  %v231_v54 = vmul.f32 0.5, %v195_v43 }
  0x41   : > { %v198_v55 = vmul.f32 -0.5, %v196_v47  ;;  %v208_v56 = vmul.f32 1.5, %v196_v47  ;;  %v220_v57 = vmul.f32 -1.5, %v196_v47  ;;  %v232_v58 = vmul.f32 0.5, %v196_v47 }
  0x42   : > { %v199_v59 = vadd.f32 %v197_v51, %v193_v35  ;;  %v211_v60 = vadd.f32 %v209_v44, %v207_v52  ;;  %v223_v61 = vadd.f32 %v221_v45, %v219_v53  ;;  %v235_v62 = vadd.f32 %v233_v46, %v231_v54 }
  0x43   : > { %v200_v63 = vadd.f32 %v198_v55, %v194_v39  ;;  %v212_v0 = vadd.f32 %v210_v48, %v208_v56  ;;  %v224_v1 = vadd.f32 %v222_v49, %v220_v57  ;;  %v236_v2 = vadd.f32 %v234_v50, %v232_v58 }
  0x44   : > { %v1491_v3 = vadd.f32 %v201_v36, %v199_v59  ;;  %v215_v4 = vadd.f32 %v213_v37, %v211_v60  ;;  %v1493_v5 = vadd.f32 %v225_v38, %v223_v61  ;;  %v1495_v6 = vadd.f32 %v235_v62, %v213_v37 }
  0x45   : > { %v1497_v7 = vadd.f32 %v202_v40, %v200_v63  ;;  %v216_v8 = vadd.f32 %v214_v41, %v212_v0  ;;  %v1499_v9 = vadd.f32 %v226_v42, %v224_v1  ;;  %v1501_v10 = vadd.f32 %v236_v2, %v214_v41 }
  0x46   : > { %v1503_v11 = vadd.f32 1.0, %v215_v4  ;;  %vm261_vm10 = vcmp.gt.s32.totalorder %v259_v29, 0  ;;  %vm263_vm11 = vcmp.gt.s32.totalorder %v260_v30, 0  ;;  %vm271_vm12 = vcmp.gt.s32.totalorder %v269_v32, 0 }
  0x47   : > { %v1505_v12 = vadd.f32 1.0, %v216_v8  ;;  %v262_v14 = vsel %vm261_vm10, %v259_v29, 0  ;;  %v264_v15 = vsel %vm263_vm11, %v260_v30, 0  ;;  %v272_v16 = vsel %vm271_vm12, %v269_v32, 0 }
  0x48   : > { %vm265_vm13 = vcmp.lt.s32.totalorder %v262_v14, 7  ;;  %vm267_vm14 = vcmp.lt.s32.totalorder %v264_v15, 7  ;;  %vm273_vm15 = vcmp.gt.s32.totalorder %v270_v33, 0  ;;  %vm275_vm0 = vcmp.lt.s32.totalorder %v272_v16, 7 }
  0x49   : > { %v1507_v17 = vsel %vm265_vm13, %v262_v14, 7  ;;  %v1509_v18 = vsel %vm267_vm14, %v264_v15, 7  ;;  %v274_v19 = vsel %vm273_vm15, %v270_v33, 0  ;;  %v1511_v20 = vsel %vm275_vm0, %v272_v16, 7 }
  0x4a   : > { %vm277_vm1 = vcmp.lt.s32.totalorder %v274_v19, 7  ;;  %v282_v22 = vperm.slane %v1488_v28, 1  ;;  %vm283_vm2 = vcmp.eq.s32.totalorder %v1480_v13, %v281_v34  ;;  %v285_v23 = vperm.slane %v1491_v3, 1 }
  0x4b   : > { %v1516_v24 = vsel %vm277_vm1, %v274_v19, 7  ;;  %v286_v27 = vperm.slane %v1497_v7, 1  ;;  %v291_v29 = vperm.slane %v1482_v21, 1  ;;  %v292_v30 = vperm.slane %v1486_v26, 1 }
  0x4c   : > { %vm284_vm3 = vcmp.eq.s32.totalorder %v1480_v13, %v282_v22  ;;  %v289_v31 = vsel %vm283_vm2, %v285_v23, 0.0  ;;  %v295_v32 = vperm.slane %v1503_v11, 1  ;;  %v296_v33 = vperm.slane %v1505_v12, 1 }
  0x4d   : > { %v290_v35 = vsel %vm284_vm3, %v286_v27, 0.0  ;;  %vm293_vm4 = vcmp.eq.s32.totalorder %v1480_v13, %v291_v29  ;;  %vm294_vm5 = vcmp.eq.s32.totalorder %v1480_v13, %v292_v30  ;;  %v301_v34 = vperm.slane %v1507_v17, 1 }
  0x4e   : > { %v297_v36 = vadd.f32 %v295_v32, %v289_v31  ;;  %v298_v37 = vadd.f32 %v296_v33, %v290_v35  ;;  %v302_v38 = vperm.slane %v1509_v18, 1  ;;  %v305_v39 = vperm.slane %v1493_v5, 1 }
  0x4f   : > { %vm1530_vm6 = vcmp.eq.s32.totalorder %v1480_v13, %v301_v34  ;;  %v306_v41 = vperm.slane %v1499_v9, 1  ;;  %v311_v42 = vperm.slane %v1511_v20, 1  ;;  %v312_v43 = vperm.slane %v1516_v24, 1 }
  0x50   : > { %v299_v44 = vsel %vm293_vm4, %v297_v36, %v289_v31  ;;  %v300_v45 = vsel %vm294_vm5, %v298_v37, %v290_v35  ;;  %vm304_vm7 = vcmp.eq.s32.totalorder %v1480_v13, %v302_v38  ;;  %v315_v46 = vperm.slane %v1495_v6, 1 }
  0x51   : > { %v307_v47 = vadd.f32 %v305_v39, %v299_v44  ;;  %v308_v48 = vadd.f32 %v306_v41, %v300_v45  ;;  %vm1540_vm8 = vcmp.eq.s32.totalorder %v1480_v13, %v311_v42  ;;  %vm1545_vm9 = vcmp.eq.s32.totalorder %v1480_v13, %v312_v43 }
  0x52   : > { %v316_v51 = vperm.slane %v1501_v10, 1  ;;  %v321_v52 = vperm.slane %v1484_v25, 2  ;;  %v325_v53 = vperm.slane %v1491_v3, 2  ;;  %v331_v54 = vperm.slane %v1482_v21, 2 }
  0x53   : > { %v309_v55 = vsel %vm1530_vm6, %v307_v47, %v299_v44  ;;  %v310_v56 = vsel %vm304_vm7, %v308_v48, %v300_v45  ;;  %v335_v57 = vperm.slane %v1503_v11, 2  ;;  %v341_v58 = vperm.slane %v1507_v17, 2 }
  0x54   : > { %v317_v59 = vadd.f32 %v315_v46, %v309_v55  ;;  %v318_v60 = vadd.f32 %v316_v51, %v310_v56  ;;  %vm323_vm10 = vcmp.eq.s32.totalorder %v1480_v13, %v321_v52  ;;  %vm333_vm11 = vcmp.eq.s32.totalorder %v1480_v13, %v331_v54 }
  0x55   : > { %v329_v61 = vsel %vm323_vm10, %v325_v53, 0.0  ;;  %vm1560_vm12 = vcmp.eq.s32.totalorder %v1480_v13, %v341_v58  ;;  %v345_v63 = vperm.slane %v1493_v5, 2  ;;  %v351_v0 = vperm.slane %v1511_v20, 2 }
  0x56   : > { %v1568_v1 = vsel %vm1540_vm8, %v317_v59, %v309_v55  ;;  %v320_v2 = vsel %vm1545_vm9, %v318_v60, %v310_v56  ;;  %v337_v4 = vadd.f32 %v335_v57, %v329_v61  ;;  %v355_v8 = vperm.slane %v1495_v6, 2 }
  0x57   : > { %vm1574_vm13 = vcmp.eq.s32.totalorder %v1480_v13, %v351_v0  ;;  %v1578_v15 = vrot.slane %v320_v2, 7  ;;  %vm384_vm14 = vcmask 1046528   ;;  %v322_v16 = vperm.slane %v1488_v28, 2 }
  0x58   : > { %v339_v19 = vsel %vm333_vm11, %v337_v4, %v329_v61  ;;  %v326_v22 = vperm.slane %v1497_v7, 2  ;;  %v332_v23 = vperm.slane %v1486_v26, 2  ;;  %v336_v27 = vperm.slane %v1505_v12, 2 }
  0x59   : > { %v347_v29 = vadd.f32 %v345_v63, %v339_v19  ;;  %v385_v30 = vsel %vm384_vm14, %v1578_v15, %v1568_v1  ;;  %vm324_vm15 = vcmp.eq.s32.totalorder %v1480_v13, %v322_v16  ;;  %v342_v31 = vperm.slane %v1509_v18, 2 }
  0x5a   : > { %v386_v32 = vrot.slane %v385_v30, 7  ;;  %v330_v33 = vsel %vm324_vm15, %v326_v22, 0.0  ;;  %vm334_vm0 = vcmp.eq.s32.totalorder %v1480_v13, %v332_v23  ;;  %v346_v35 = vperm.slane %v1499_v9, 2 }
  0x5b   : > { %v349_v34 = vsel %vm1560_vm12, %v347_v29, %v339_v19  ;;  %v338_v36 = vadd.f32 %v336_v27, %v330_v33  ;;  %vm1593_vm1 = vcmp.eq.s32.totalorder %v1480_v13, %v342_v31  ;;  %v352_v38 = vperm.slane %v1516_v24, 2 }
  0x5c   : > { %v357_v39 = vadd.f32 %v355_v8, %v349_v34  ;;  %v401_v40 = vperm.slane %v386_v32, 0  ;;  %v356_v41 = vperm.slane %v1501_v10, 2  ;;  %v402_v42 = vperm.slane %v386_v32, 1 }
  0x5d   : > { %v340_v43 = vsel %vm334_vm0, %v338_v36, %v330_v33  ;;  %vm1600_vm2 = vcmp.eq.s32.totalorder %v1480_v13, %v352_v38  ;;  %vm381_vm3 = vcmask 1046534   ;;  %vm378_vm4 = vcmask 1045509  }
  0x5e   : > { %v1606_v45 = vsel %vm1574_vm13, %v357_v39, %v349_v34  ;;  %v348_v46 = vadd.f32 %v346_v35, %v340_v43  ;;  %v382_v47 = vsel %vm381_vm3, %v1568_v1, %v1578_v15  ;;  %v379_v48 = vsel %vm378_vm4, %v1568_v1, %v1578_v15 }
  0x5f   : > { %v1613_v49 = vmul.f32 %v401_v40, %v1606_v45  ;;  %v383_v13 = vrot.slane %v382_v47, 6  ;;  %v380_v50 = vrot.slane %v379_v48, 5  ;;  %vm375_vm5 = vcmask 1044484   ;;  %v657_v47 = vld [vmem:[#allocation5 + $0x18] sm:$0xff]  ;;  %v584_v48 = vld [vmem:[#allocation5 + $0x10] sm:$0xff] }
  0x60   : > { %v350_v51 = vsel %vm1593_vm1, %v348_v46, %v340_v43  ;;  %v376_v52 = vsel %vm375_vm5, %v1568_v1, %v1578_v15  ;;  %vm372_vm6 = vcmask 1043459   ;;  %vm369_vm7 = vcmask 1042434   ;;  %v435_v46 = vld [vmem:[#allocation5] sm:$0xff] }
  0x61   : > { %448 = vmatpush.msra.mxu0 %v1613_v49  ;;  %v358_v53 = vadd.f32 %v356_v41, %v350_v51  ;;  %523 = vmatpush.msra.mxu2 %v1613_v49  ;;  %v399_v54 = vperm.slane %v383_v13, 0  ;;  %v400_v55 = vperm.slane %v383_v13, 1  ;;  %v397_v56 = vperm.slane %v380_v50, 0  ;;  %v730_v13 = vld [vmem:[#allocation5 + $0x20] sm:$0xff] }
  0x62   : > { %v398_v57 = vperm.slane %v380_v50, 1  ;;  %v377_v58 = vrot.slane %v376_v52, 4  ;;  %v373_v59 = vsel %vm372_vm6, %v1568_v1, %v1578_v15  ;;  %v370_v60 = vsel %vm369_vm7, %v1568_v1, %v1578_v15  ;;  %v803_v50 = vld [vmem:[#allocation5 + $0x28] sm:$0xff] }
  0x63   : > { %v360_v61 = vsel %vm1600_vm2, %v358_v53, %v350_v51  ;;  %v1628_v62 = vmul.f32 %v399_v54, %v1606_v45  ;;  %v1631_v63 = vmul.f32 %v397_v56, %v1606_v45  ;;  %v374_v0 = vrot.slane %v373_v59, 3  ;;  %v949_v51 = vld [vmem:[#allocation5 + $0x38] sm:$0xff] }
  0x64   : > { %v1633_v2 = vmul.f32 %v402_v42, %v360_v61  ;;  %v1635_v4 = vmul.f32 %v400_v55, %v360_v61  ;;  %v395_v8 = vperm.slane %v377_v58, 0  ;;  %v1639_v14 = vmul.f32 %v398_v57, %v360_v61 }
  0x65   : > { %449 = vmatpush.msra.mxu0 %v1628_v62  ;;  %524 = vmatpush.msra.mxu2 %v1628_v62  ;;  %v396_v16 = vperm.slane %v377_v58, 1  ;;  %v393_v19 = vperm.slane %v374_v0, 0  ;;  %v371_v22 = vrot.slane %v370_v60, 2  ;;  %v394_v27 = vperm.slane %v374_v0, 1 }
  0x66   : > { %468 = vmatpush.msra.mxu1 %v1633_v2  ;;  %543 = vmatpush.msra.mxu3 %v1633_v2  ;;  %v1644_v23 = vmul.f32 %v395_v8, %v1606_v45  ;;  %vm366_vm8 = vcmask 1041409   ;;  %vm364_vm9 = vcmask 1040384   ;;  %vm436_vm10 = vcmask 523264  }
  0x67   : > { %450 = vmatpush.msra.mxu0 %v1631_v63  ;;  %525 = vmatpush.msra.mxu2 %v1631_v63  ;;  %v1649_v29 = vmul.f32 %v393_v19, %v1606_v45  ;;  %v391_v30 = vperm.slane %v371_v22, 0  ;;  %v1653_v31 = vmul.f32 %v396_v16, %v360_v61  ;;  %v392_v32 = vperm.slane %v371_v22, 1 }
  0x68   : > { %469 = vmatpush.msra.mxu1 %v1635_v4  ;;  %544 = vmatpush.msra.mxu3 %v1635_v4  ;;  %v367_v33 = vsel %vm366_vm8, %v1568_v1, %v1578_v15  ;;  %v365_v35 = vsel %vm364_vm9, %v1568_v1, %v1578_v15  ;;  %v1666_v38 = vmul.f32 %v394_v27, %v360_v61  ;;  %vm480_vm11 = vcmp.eq.s32.totalorder %v1484_v25, 0 }
  0x69   : > { %451 = vmatpush.msra.mxu0 %v1644_v23  ;;  %526 = vmatpush.msra.mxu2 %v1644_v23  ;;  %v1662_v34 = vmul.f32 %v391_v30, %v1606_v45  ;;  %v368_v36 = vrot.slane %v367_v33, 1  ;;  %v387_v37 = vperm.slane %v365_v35, 0  ;;  %v1672_v39 = vmul.f32 %v392_v32, %v360_v61 }
  0x6a   : > { %470 = vmatpush.msra.mxu1 %v1639_v14  ;;  %545 = vmatpush.msra.mxu3 %v1639_v14  ;;  %v388_v40 = vperm.slane %v365_v35, 1  ;;  %vm481_vm12 = vcmp.eq.s32.totalorder %v1488_v28, 0  ;;  %vm555_vm13 = vcmp.eq.s32.totalorder %v1484_v25, 1  ;;  %v484_v52 = vsel %vm480_vm11, %v1491_v3, 0.0 }
  0x6b   : > { %452 = vmatpush.msra.mxu0 %v1649_v29  ;;  %527 = vmatpush.msra.mxu2 %v1649_v29  ;;  %v389_v1 = vperm.slane %v368_v36, 0  ;;  %v390_v15 = vperm.slane %v368_v36, 1  ;;  %v1680_v42 = vmul.f32 %v387_v37, %v1606_v45  ;;  %vm556_vm14 = vcmp.eq.s32.totalorder %v1488_v28, 1 }
  0x6c   : > { %471 = vmatpush.msra.mxu1 %v1653_v31  ;;  %546 = vmatpush.msra.mxu3 %v1653_v31  ;;  %v1690_v44 = vmul.f32 %v388_v40, %v360_v61  ;;  %v485_v53 = vsel %vm481_vm12, %v1497_v7, 0.0  ;;  %v557_v54 = vsel %vm555_vm13, %v1491_v3, 0.0  ;;  %v488_v55 = vadd.f32 %v484_v52, %v1503_v11 }
  0x6d   : > { %453 = vmatpush.msra.mxu0 %v1662_v34  ;;  %528 = vmatpush.msra.mxu2 %v1662_v34  ;;  %v1677_v41 = vmul.f32 %v389_v1, %v1606_v45  ;;  %v1684_v43 = vmul.f32 %v390_v15, %v360_v61  ;;  %v511_v45 = vld [vmem:[#allocation5 + $0x8] sm:$0xff]  ;;  %v558_v56 = vsel %vm556_vm14, %v1497_v7, 0.0  ;;  %vm628_vm15 = vcmp.eq.s32.totalorder %v1484_v25, 2 }
  0x6e   : > { %472 = vmatpush.msra.mxu1 %v1666_v38  ;;  %547 = vmatpush.msra.mxu3 %v1666_v38  ;;  %vm486_vm0 = vcmp.eq.s32.totalorder %v1482_v21, 0  ;;  %v489_v57 = vadd.f32 %v485_v53, %v1505_v12  ;;  %v561_v58 = vadd.f32 %v557_v54, %v1503_v11  ;;  %vm487_vm1 = vcmp.eq.s32.totalorder %v1486_v26, 0 }
  0x6f   : > { %454 = vmatpush.msra.mxu0 %v1677_v41  ;;  %529 = vmatpush.msra.mxu2 %v1677_v41  ;;  %vm559_vm2 = vcmp.eq.s32.totalorder %v1482_v21, 1  ;;  %v562_v59 = vadd.f32 %v558_v56, %v1505_v12  ;;  %v630_v60 = vsel %vm628_vm15, %v1491_v3, 0.0  ;;  %v490_v61 = vsel %vm486_vm0, %v488_v55, %v484_v52 }
  0x70   : > { %473 = vmatpush.msra.mxu1 %v1672_v39  ;;  %548 = vmatpush.msra.mxu3 %v1672_v39  ;;  %vm560_vm3 = vcmp.eq.s32.totalorder %v1486_v26, 1  ;;  %v634_v0 = vadd.f32 %v630_v60, %v1503_v11  ;;  %vm632_vm4 = vcmp.eq.s32.totalorder %v1482_v21, 2  ;;  %vm629_vm5 = vcmp.eq.s32.totalorder %v1488_v28, 2 }
  0x71   : > { %455 = vmatpush.msra.mxu0 %v1680_v42  ;;  %530 = vmatpush.msra.mxu2 %v1680_v42  ;;  %vm492_vm6 = vcmp.eq.s32.totalorder %v1507_v17, 0  ;;  %vm493_vm7 = vcmp.eq.s32.totalorder %v1509_v18, 0  ;;  %vm565_vm8 = vcmp.eq.s32.totalorder %v1507_v17, 1  ;;  %v631_v22 = vsel %vm629_vm5, %v1497_v7, 0.0 }
  0x72   : > { %474 = vmatpush.msra.mxu1 %v1684_v43  ;;  %549 = vmatpush.msra.mxu3 %v1684_v43  ;;  %v636_v19 = vsel %vm632_vm4, %v634_v0, %v630_v60  ;;  %vm566_vm9 = vcmp.eq.s32.totalorder %v1509_v18, 1  ;;  %vm638_vm11 = vcmp.eq.s32.totalorder %v1507_v17, 2  ;;  %vm633_vm12 = vcmp.eq.s32.totalorder %v1486_v26, 2 }
  0x73   : > { %596 = vmatpush.msrb.mxu0 %v1613_v49  ;;  %669 = vmatpush.msrb.mxu2 %v1613_v49  ;;  %v640_v30 = vadd.f32 %v636_v19, %v1493_v5  ;;  %vm702_vm13 = vcmp.eq.s32.totalorder %v1488_v28, 3  ;;  %vm498_vm14 = vcmp.eq.s32.totalorder %v1511_v20, 0  ;;  %vm499_vm15 = vcmp.eq.s32.totalorder %v1516_v24, 0 }
  0x74   : > { %475 = vmatpush.msra.mxu1 %v1690_v44  ;;  %550 = vmatpush.msra.mxu3 %v1690_v44  ;;  %vm571_vm0 = vcmp.eq.s32.totalorder %v1511_v20, 1  ;;  %vm775_vm4 = vcmp.eq.s32.totalorder %v1488_v28, 4  ;;  %vm644_vm5 = vcmp.eq.s32.totalorder %v1511_v20, 2 }
  0x75   : > { %597 = vmatpush.msrb.mxu0 %v1628_v62  ;;  %670 = vmatpush.msrb.mxu2 %v1628_v62 }
  0x76   : > { %616 = vmatpush.msrb.mxu1 %v1633_v2  ;;  %689 = vmatpush.msrb.mxu3 %v1633_v2 }
  0x77   : > { %598 = vmatpush.msrb.mxu0 %v1631_v63  ;;  %671 = vmatpush.msrb.mxu2 %v1631_v63 }
  0x78   : > { %617 = vmatpush.msrb.mxu1 %v1635_v4  ;;  %690 = vmatpush.msrb.mxu3 %v1635_v4 }
  0x79   : > { %599 = vmatpush.msrb.mxu0 %v1644_v23  ;;  %672 = vmatpush.msrb.mxu2 %v1644_v23 }
  0x7a   : > { %618 = vmatpush.msrb.mxu1 %v1639_v14  ;;  %691 = vmatpush.msrb.mxu3 %v1639_v14 }
  0x7b   : > { %600 = vmatpush.msrb.mxu0 %v1649_v29  ;;  %673 = vmatpush.msrb.mxu2 %v1649_v29 }
  0x7c   : > { %619 = vmatpush.msrb.mxu1 %v1653_v31  ;;  %692 = vmatpush.msrb.mxu3 %v1653_v31 }
  0x7d   : > { %1135 = vmatmul.msk.f32.vlgmr.msra.gmra.mxu2 %vm436_vm10, %v511_v45  ;;  %1136 = vmatmul.msk.f32.vlgmr.msra.gmra.mxu3 %vm436_vm10, %v511_v45 }
  0x7e   : > { %620 = vmatpush.msrb.mxu1 %v1666_v38  ;;  %693 = vmatpush.msrb.mxu3 %v1666_v38 }
  0x7f   : > { %601 = vmatpush.msrb.mxu0 %v1662_v34  ;;  %674 = vmatpush.msrb.mxu2 %v1662_v34 }
  0x80   : > { %621 = vmatpush.msrb.mxu1 %v1672_v39  ;;  %694 = vmatpush.msrb.mxu3 %v1672_v39 }
  0x81   : > { %602 = vmatpush.msrb.mxu0 %v1677_v41  ;;  %675 = vmatpush.msrb.mxu2 %v1677_v41 }
  0x82   : > { %622 = vmatpush.msrb.mxu1 %v1684_v43  ;;  %695 = vmatpush.msrb.mxu3 %v1684_v43 }
  0x83   : > { %1133 = vmatmul.msk.f32.vlgmr.msra.gmra.mxu0 %vm436_vm10, %v435_v46  ;;  %1134 = vmatmul.msk.f32.vlgmr.msra.gmra.mxu1 %vm436_vm10, %v435_v46 }
  0x84   : > { %603 = vmatpush.msrb.mxu0 %v1680_v42  ;;  %623 = vmatpush.msrb.mxu1 %v1690_v44 }
  0x85   : > { %676 = vmatpush.msrb.mxu2 %v1680_v42  ;;  %696 = vmatpush.msrb.mxu3 %v1690_v44 }
  0x86   : > { %742 = vmatpush.msra.mxu0 %v1613_v49  ;;  %762 = vmatpush.msra.mxu1 %v1633_v2 }
  0x87   : > { %815 = vmatpush.msra.mxu2 %v1613_v49  ;;  %835 = vmatpush.msra.mxu3 %v1633_v2 }
  0x88   : > { %1139 = vmatmul.msk.f32.vlgmr.msrb.gmra.mxu2 %vm436_vm10, %v657_v47  ;;  %1140 = vmatmul.msk.f32.vlgmr.msrb.gmra.mxu3 %vm436_vm10, %v657_v47 }
  0x89   : > { %743 = vmatpush.msra.mxu0 %v1628_v62  ;;  %763 = vmatpush.msra.mxu1 %v1635_v4 }
  0x8a   : > { %816 = vmatpush.msra.mxu2 %v1628_v62  ;;  %836 = vmatpush.msra.mxu3 %v1635_v4 }
  0x8b   : > { %744 = vmatpush.msra.mxu0 %v1631_v63  ;;  %764 = vmatpush.msra.mxu1 %v1639_v14 }
  0x8c   : > { %817 = vmatpush.msra.mxu2 %v1631_v63  ;;  %837 = vmatpush.msra.mxu3 %v1639_v14 }
  0x8d   : > { %1137 = vmatmul.msk.f32.vlgmr.msrb.gmra.mxu0 %vm436_vm10, %v584_v48  ;;  %1138 = vmatmul.msk.f32.vlgmr.msrb.gmra.mxu1 %vm436_vm10, %v584_v48 }
  0x8e   : > { %745 = vmatpush.msra.mxu0 %v1644_v23  ;;  %765 = vmatpush.msra.mxu1 %v1653_v31 }
  0x8f   : > { %818 = vmatpush.msra.mxu2 %v1644_v23  ;;  %838 = vmatpush.msra.mxu3 %v1653_v31 }
  0x90   : > { %746 = vmatpush.msra.mxu0 %v1649_v29  ;;  %766 = vmatpush.msra.mxu1 %v1666_v38 }
  0x91   : > { %819 = vmatpush.msra.mxu2 %v1649_v29  ;;  %839 = vmatpush.msra.mxu3 %v1666_v38 }
  0x92   : > { %747 = vmatpush.msra.mxu0 %v1662_v34  ;;  %767 = vmatpush.msra.mxu1 %v1672_v39 }
  0x93   : > { %820 = vmatpush.msra.mxu2 %v1662_v34  ;;  %840 = vmatpush.msra.mxu3 %v1672_v39 }
  0x94   : > { %748 = vmatpush.msra.mxu0 %v1677_v41  ;;  %768 = vmatpush.msra.mxu1 %v1684_v43 }
  0x95   : > { %821 = vmatpush.msra.mxu2 %v1677_v41  ;;  %841 = vmatpush.msra.mxu3 %v1684_v43 }
  0x96   : > { %749 = vmatpush.msra.mxu0 %v1680_v42  ;;  %769 = vmatpush.msra.mxu1 %v1690_v44 }
  0x97   : > { %822 = vmatpush.msra.mxu2 %v1680_v42  ;;  %842 = vmatpush.msra.mxu3 %v1690_v44 }
  0x98   : > { %1141 = vmatmul.msk.f32.vlgmr.msra.gmra.mxu0 %vm436_vm10, %v730_v13  ;;  %1142 = vmatmul.msk.f32.vlgmr.msra.gmra.mxu1 %vm436_vm10, %v730_v13 }
  0x99   : > { %1143 = vmatmul.msk.f32.vlgmr.msra.gmra.mxu2 %vm436_vm10, %v803_v50  ;;  %1144 = vmatmul.msk.f32.vlgmr.msra.gmra.mxu3 %vm436_vm10, %v803_v50 }
  0x9a   : > { %888 = vmatpush.msrb.mxu0 %v1613_v49  ;;  %908 = vmatpush.msrb.mxu1 %v1633_v2 }
  0x9b   : > { %961 = vmatpush.msrb.mxu2 %v1613_v49  ;;  %981 = vmatpush.msrb.mxu3 %v1633_v2  ;;  %v876_v49 = vld [vmem:[#allocation5 + $0x30] sm:$0xff]  ;;  %v494_v2 = vadd.f32 %v490_v61, %v1493_v5 }
  0x9c   : > { %889 = vmatpush.msrb.mxu0 %v1628_v62  ;;  %909 = vmatpush.msrb.mxu1 %v1635_v4 }
  0x9d   : > { %962 = vmatpush.msrb.mxu2 %v1628_v62  ;;  %982 = vmatpush.msrb.mxu3 %v1635_v4  ;;  %v491_v62 = vsel %vm487_vm1, %v489_v57, %v485_v53  ;;  %v564_v4 = vsel %vm560_vm3, %v562_v59, %v558_v56  ;;  %vm572_vm1 = vcmp.eq.s32.totalorder %v1516_v24, 1  ;;  %vm774_vm3 = vcmp.eq.s32.totalorder %v1484_v25, 4 }
  0x9e   : > { %890 = vmatpush.msrb.mxu0 %v1631_v63  ;;  %910 = vmatpush.msrb.mxu1 %v1639_v14  ;;  %v495_v8 = vadd.f32 %v491_v62, %v1499_v9  ;;  %v568_v16 = vadd.f32 %v564_v4, %v1499_v9 }
  0x9f   : > { %963 = vmatpush.msrb.mxu2 %v1631_v63  ;;  %983 = vmatpush.msrb.mxu3 %v1639_v14  ;;  %v563_v63 = vsel %vm559_vm2, %v561_v58, %v557_v54  ;;  %vm705_vm2 = vcmp.eq.s32.totalorder %v1482_v21, 3 }
  0xa0   : > { %891 = vmatpush.msrb.mxu0 %v1644_v23  ;;  %911 = vmatpush.msrb.mxu1 %v1653_v31  ;;  %v567_v14 = vadd.f32 %v563_v63, %v1493_v5  ;;  %v497_v27 = vsel %vm493_vm7, %v495_v8, %v491_v62  ;;  %v570_v33 = vsel %vm566_vm9, %v568_v16, %v564_v4  ;;  %vm706_vm7 = vcmp.eq.s32.totalorder %v1486_v26, 3 }
  0xa1   : > { %964 = vmatpush.msrb.mxu2 %v1644_v23  ;;  %984 = vmatpush.msrb.mxu3 %v1653_v31  ;;  %v496_v23 = vsel %vm492_vm6, %v494_v2, %v490_v61  ;;  %v635_v31 = vadd.f32 %v631_v22, %v1505_v12  ;;  %v501_v35 = vadd.f32 %v497_v27, %v1501_v10  ;;  %vm639_vm6 = vcmp.eq.s32.totalorder %v1509_v18, 2 }
  0xa2   : > { %892 = vmatpush.msrb.mxu0 %v1649_v29  ;;  %912 = vmatpush.msrb.mxu1 %v1666_v38  ;;  %v500_v32 = vadd.f32 %v496_v23, %v1495_v6  ;;  %v574_v37 = vadd.f32 %v570_v33, %v1501_v10  ;;  %vm645_vm9 = vcmp.eq.s32.totalorder %v1516_v24, 2 }
  0xa3   : > { %965 = vmatpush.msrb.mxu2 %v1649_v29  ;;  %985 = vmatpush.msrb.mxu3 %v1666_v38  ;;  %v569_v29 = vsel %vm565_vm8, %v567_v14, %v563_v63  ;;  %v642_v38 = vsel %vm638_vm11, %v640_v30, %v636_v19  ;;  %v637_v1 = vsel %vm633_vm12, %v635_v31, %v631_v22  ;;  %vm847_vm8 = vcmp.eq.s32.totalorder %v1484_v25, 5 }
  0xa4   : > { %893 = vmatpush.msrb.mxu0 %v1662_v34  ;;  %913 = vmatpush.msrb.mxu1 %v1672_v39  ;;  %v1857_v40 = vsel %vm498_vm14, %v500_v32, %v496_v23  ;;  %v1868_v45 = vsel %vm572_vm1, %v574_v37, %v570_v33  ;;  %vm717_vm11 = vcmp.eq.s32.totalorder %v1511_v20, 3  ;;  %v849_v59 = vsel %vm847_vm8, %v1491_v3, 0.0 }
  0xa5   : > { %966 = vmatpush.msrb.mxu2 %v1662_v34  ;;  %986 = vmatpush.msrb.mxu3 %v1672_v39  ;;  %v573_v34 = vadd.f32 %v569_v29, %v1495_v6  ;;  %v704_v39 = vsel %vm702_vm13, %v1497_v7, 0.0  ;;  %v504_v47 = vperm.slane %v1857_v40, 0  ;;  %v578_v52 = vperm.slane %v1868_v45, 0 }
  0xa6   : > { %894 = vmatpush.msrb.mxu0 %v1677_v41  ;;  %914 = vmatpush.msrb.mxu1 %v1684_v43  ;;  %v708_v46 = vadd.f32 %v704_v39, %v1505_v12  ;;  %vm848_vm12 = vcmp.eq.s32.totalorder %v1488_v28, 5  ;;  %vm778_vm13 = vcmp.eq.s32.totalorder %v1482_v21, 4  ;;  %vm779_vm14 = vcmp.eq.s32.totalorder %v1486_v26, 4 }
  0xa7   : > { %967 = vmatpush.msrb.mxu2 %v1677_v41  ;;  %987 = vmatpush.msrb.mxu3 %v1684_v43  ;;  %v1859_v41 = vsel %vm499_vm15, %v501_v35, %v497_v27  ;;  %v646_v43 = vadd.f32 %v642_v38, %v1495_v6  ;;  %vm712_vm15 = vcmp.eq.s32.totalorder %v1509_v18, 3  ;;  %vm921_vm1 = vcmp.eq.s32.totalorder %v1488_v28, 6 }
  0xa8   : > { %895 = vmatpush.msrb.mxu0 %v1680_v42  ;;  %915 = vmatpush.msrb.mxu1 %v1690_v44  ;;  %v505_v48 = vperm.slane %v1859_v41, 0  ;;  %v710_v56 = vsel %vm706_vm7, %v708_v46, %v704_v39  ;;  %v853_v4 = vadd.f32 %v849_v59, %v1503_v11  ;;  %v850_v8 = vsel %vm848_vm12, %v1497_v7, 0.0 }
  0xa9   : > { %968 = vmatpush.msrb.mxu2 %v1680_v42  ;;  %988 = vmatpush.msrb.mxu3 %v1690_v44  ;;  %v1861_v42 = vsel %vm571_vm0, %v573_v34, %v569_v29  ;;  %v641_v44 = vadd.f32 %v637_v1, %v1499_v9  ;;  %v1881_v53 = vsel %vm644_vm5, %v646_v43, %v642_v38  ;;  %vm920_vm0 = vcmp.eq.s32.totalorder %v1484_v25, 6 }
  0xaa   : > { %1145 = vmatmul.msk.f32.vlgmr.msrb.gmra.mxu0 %vm436_vm10, %v876_v49  ;;  %1146 = vmatmul.msk.f32.vlgmr.msrb.gmra.mxu1 %vm436_vm10, %v876_v49  ;;  %v577_v50 = vperm.slane %v1861_v42, 0  ;;  %v776_v49 = vsel %vm774_vm3, %v1491_v3, 0.0  ;;  %v650_v60 = vperm.slane %v1881_v53, 0  ;;  %v714_v0 = vadd.f32 %v710_v56, %v1499_v9 }
  0xab   : > { %1147 = vmatmul.msk.f32.vlgmr.msrb.gmra.mxu2 %vm436_vm10, %v949_v51  ;;  %1148 = vmatmul.msk.f32.vlgmr.msrb.gmra.mxu3 %vm436_vm10, %v949_v51  ;;  %vm701_vm10 = vcmp.eq.s32.totalorder %v1484_v25, 3  ;;  %v777_v51 = vsel %vm775_vm4, %v1497_v7, 0.0  ;;  %v643_v54 = vsel %vm639_vm6, %v641_v44, %v637_v1  ;;  %v780_v57 = vadd.f32 %v776_v49, %v1503_v11 }
  0xac   : > { %v703_v36 = vsel %vm701_vm10, %v1491_v3, 0.0  ;;  %vm711_vm10 = vcmp.eq.s32.totalorder %v1507_v17, 3  ;;  %v781_v58 = vadd.f32 %v777_v51, %v1505_v12  ;;  %v647_v61 = vadd.f32 %v643_v54, %v1501_v10 }
  0xad   : > { %v707_v15 = vadd.f32 %v703_v36, %v1503_v11  ;;  %v782_v14 = vsel %vm778_vm13, %v780_v57, %v776_v49  ;;  %vm784_vm3 = vcmp.eq.s32.totalorder %v1507_v17, 4  ;;  %vm851_vm4 = vcmp.eq.s32.totalorder %v1482_v21, 5 }
  0xae   : > { %v783_v16 = vsel %vm779_vm14, %v781_v58, %v777_v51  ;;  %v1910_v19 = vsel %vm645_vm9, %v647_v61, %v643_v54  ;;  %v922_v22 = vsel %vm920_vm0, %v1491_v3, 0.0  ;;  %v923_v23 = vsel %vm921_vm1, %v1497_v7, 0.0 }
  0xaf   : > { %v709_v13 = vsel %vm705_vm2, %v707_v15, %v703_v36  ;;  %vm718_vm2 = vcmp.eq.s32.totalorder %v1516_v24, 3  ;;  %vm993_vm5 = vcmp.eq.s32.totalorder %v1484_v25, 7  ;;  %v716_v29 = vsel %vm712_vm15, %v714_v0, %v710_v56 }
  0xb0   : > { %v713_v55 = vadd.f32 %v709_v13, %v1493_v5  ;;  %v854_v30 = vadd.f32 %v850_v8, %v1505_v12  ;;  %vm994_vm6 = vcmp.eq.s32.totalorder %v1488_v28, 7  ;;  %v786_v31 = vadd.f32 %v782_v14, %v1493_v5 }
  0xb1   : > { %v787_v32 = vadd.f32 %v783_v16, %v1499_v9  ;;  %v855_v33 = vsel %vm851_vm4, %v853_v4, %v849_v59  ;;  %vm852_vm7 = vcmp.eq.s32.totalorder %v1486_v26, 5  ;;  %vm785_vm8 = vcmp.eq.s32.totalorder %v1509_v18, 4 }
  0xb2   : > { %v715_v2 = vsel %vm711_vm10, %v713_v55, %v709_v13  ;;  %v926_v25 = vadd.f32 %v922_v22, %v1503_v11  ;;  %v927_v35 = vadd.f32 %v923_v23, %v1505_v12  ;;  %v995_v34 = vsel %vm993_vm5, %v1491_v3, 0.0 }
  0xb3   : > { %v719_v27 = vadd.f32 %v715_v2, %v1495_v6  ;;  %v720_v36 = vadd.f32 %v716_v29, %v1501_v10  ;;  %vm790_vm9 = vcmp.eq.s32.totalorder %v1511_v20, 4  ;;  %vm924_vm10 = vcmp.eq.s32.totalorder %v1482_v21, 6 }
  0xb4   : > { %vm925_vm12 = vcmp.eq.s32.totalorder %v1486_v26, 6  ;;  %v996_v28 = vsel %vm994_vm6, %v1497_v7, 0.0  ;;  %v651_v1 = vperm.slane %v1910_v19, 0  ;;  %v859_v3 = vadd.f32 %v855_v33, %v1493_v5 }
  0xb5   : > { %v1935_v15 = vsel %vm717_vm11, %v719_v27, %v715_v2  ;;  %v856_v39 = vsel %vm852_vm7, %v854_v30, %v850_v8  ;;  %v788_v43 = vsel %vm784_vm3, %v786_v31, %v782_v14  ;;  %v789_v44 = vsel %vm785_vm8, %v787_v32, %v783_v16 }
  0xb6   : > { %vm857_vm13 = vcmp.eq.s32.totalorder %v1507_v17, 5  ;;  %v999_v7 = vadd.f32 %v995_v34, %v1503_v11  ;;  %v928_v49 = vsel %vm924_vm10, %v926_v25, %v922_v22  ;;  %v929_v51 = vsel %vm925_vm12, %v927_v35, %v923_v23 }
  0xb7   : > { %vm997_vm11 = vcmp.eq.s32.totalorder %v1482_v21, 7  ;;  %v1000_v54 = vadd.f32 %v996_v28, %v1505_v12  ;;  %v723_v55 = vperm.slane %v1935_v15, 0  ;;  %v722_v56 = vsel %vm718_vm2, %v720_v36, %v716_v29 }
  0xb8   : > { %v860_v57 = vadd.f32 %v856_v39, %v1499_v9  ;;  %vm998_vm14 = vcmp.eq.s32.totalorder %v1486_v26, 7  ;;  %v792_v58 = vadd.f32 %v788_v43, %v1495_v6  ;;  %v793_v11 = vadd.f32 %v789_v44, %v1501_v10 }
  0xb9   : > { %v861_v59 = vsel %vm857_vm13, %v859_v3, %v855_v33  ;;  %vm858_vm15 = vcmp.eq.s32.totalorder %v1509_v18, 5  ;;  %v932_v12 = vadd.f32 %v928_v49, %v1493_v5  ;;  %v933_v61 = vadd.f32 %v929_v51, %v1499_v9 }
  0xba   : > { %v1001_v0 = vsel %vm997_vm11, %v999_v7, %v995_v34  ;;  %vm930_vm0 = vcmp.eq.s32.totalorder %v1507_v17, 6  ;;  %vm931_vm1 = vcmp.eq.s32.totalorder %v1509_v18, 6  ;;  %v1002_v26 = vsel %vm998_vm14, %v1000_v54, %v996_v28 }
  0xbb   : > { %v724_v8 = vperm.slane %v722_v56, 0  ;;  %vm791_vm2 = vcmp.eq.s32.totalorder %v1516_v24, 4  ;;  %vm863_vm3 = vcmp.eq.s32.totalorder %v1511_v20, 5  ;;  %v1005_v41 = vadd.f32 %v1001_v0, %v1493_v5 }
  0xbc   : > { %vm1003_vm4 = vcmp.eq.s32.totalorder %v1507_v17, 7  ;;  %v1006_v42 = vadd.f32 %v1002_v26, %v1499_v9  ;;  %v794_v45 = vsel %vm790_vm9, %v792_v58, %v788_v43  ;;  %vm864_vm5 = vcmp.eq.s32.totalorder %v1516_v24, 5 }
  0xbd   : > { %vm1004_vm6 = vcmp.eq.s32.totalorder %v1509_v18, 7  ;;  %v795_v5 = vsel %vm791_vm2, %v793_v11, %v789_v44  ;;  %v1007_v31 = vsel %vm1003_vm4, %v1005_v41, %v1001_v0  ;;  %vm936_vm7 = vcmp.eq.s32.totalorder %v1511_v20, 6 }
  0xbe   : > { %vm937_vm8 = vcmp.eq.s32.totalorder %v1516_v24, 6  ;;  %v1008_v18 = vsel %vm1004_vm6, %v1006_v42, %v1002_v26  ;;  %v796_v33 = vperm.slane %v794_v45, 0  ;;  %v797_v25 = vperm.slane %v795_v5, 0 }
  0xbf   : > { %vm1009_vm9 = vcmp.eq.s32.totalorder %v1511_v20, 7  ;;  %v1011_v34 = vadd.f32 %v1007_v31, %v1495_v6  ;;  %vm1010_vm10 = vcmp.eq.s32.totalorder %v1516_v24, 7 }
 0x100   : > { %v457_v62 = vpop.f32.mrf.mxu0  ;;  %v1895_v63 = vpop.f32.mrf.mxu1 }
 0x101   : > { %v532_v37 = vpop.f32.mrf.mxu2  ;;  %v552_v38 = vpop.f32.mrf.mxu3  ;;  %v506_v21 = vmul.f32 %v504_v47, %v457_v62  ;;  %v507_v2 = vmul.f32 %v505_v48, %v1895_v63  ;;  %v865_v47 = vadd.f32 %v861_v59, %v1495_v6  ;;  %v862_v62 = vsel %vm858_vm15, %v860_v57, %v856_v39 }
 0x102   : > { %v579_v4 = vmul.f32 %v577_v50, %v532_v37  ;;  %v580_v40 = vmul.f32 %v578_v52, %v552_v38  ;;  %v934_v48 = vsel %vm930_vm0, %v932_v12, %v928_v49  ;;  %v935_v63 = vsel %vm931_vm1, %v933_v61, %v929_v51 }
 0x103   : > { %v866_v52 = vadd.f32 %v862_v62, %v1501_v10  ;;  %v867_v22 = vsel %vm863_vm3, %v865_v47, %v861_v59  ;;  %v938_v29 = vadd.f32 %v934_v48, %v1495_v6  ;;  %v939_v30 = vadd.f32 %v935_v63, %v1501_v10 }
 0x104   : > { %v581_v16 = vadd.f32 %v579_v4, %v506_v21  ;;  %v582_v19 = vadd.f32 %v580_v40, %v507_v2  ;;  %v869_v35 = vperm.slane %v867_v22, 0  ;;  %v1012_v37 = vadd.f32 %v1008_v18, %v1501_v10 }
 0x105   : > { %v868_v53 = vsel %vm864_vm5, %v866_v52, %v862_v62  ;;  %v940_v17 = vsel %vm936_vm7, %v938_v29, %v934_v48  ;;  %v941_v28 = vsel %vm937_vm8, %v939_v30, %v935_v63  ;;  %v1013_v6 = vsel %vm1009_vm9, %v1011_v34, %v1007_v31 }
 0x106   : > { %v870_v15 = vperm.slane %v868_v53, 0  ;;  %v942_v7 = vperm.slane %v940_v17, 0  ;;  %v1014_v54 = vsel %vm1010_vm10, %v1012_v37, %v1008_v18  ;;  %v1015_v24 = vperm.slane %v1013_v6, 0 }
 0x107   : > { %v1016_v21 = vperm.slane %v1014_v54, 0 }
 0x10a   : > { %v605_v46 = vpop.f32.mrf.mxu0  ;;  %v625_v13 = vpop.f32.mrf.mxu1 }
 0x10b   : > { %v678_v50 = vpop.f32.mrf.mxu2  ;;  %v698_v14 = vpop.f32.mrf.mxu3  ;;  %v652_v23 = vmul.f32 %v650_v60, %v605_v46  ;;  %v653_v32 = vmul.f32 %v651_v1, %v625_v13  ;;  %v943_v46 = vperm.slane %v941_v28, 0 }
 0x10c   : > { %v725_v60 = vmul.f32 %v723_v55, %v678_v50  ;;  %v726_v1 = vmul.f32 %v724_v8, %v698_v14 }
 0x10d   : > { %v654_v36 = vadd.f32 %v652_v23, %v581_v16  ;;  %v655_v38 = vadd.f32 %v653_v32, %v582_v19 }
 0x10f   : > { %v727_v13 = vadd.f32 %v725_v60, %v654_v36  ;;  %v728_v10 = vadd.f32 %v726_v1, %v655_v38 }
 0x115   : > { %v751_v27 = vpop.f32.mrf.mxu0  ;;  %v771_v9 = vpop.f32.mrf.mxu1 }
 0x116   : > { %v798_v3 = vmul.f32 %v796_v33, %v751_v27  ;;  %v799_v44 = vmul.f32 %v797_v25, %v771_v9 }
 0x118   : > { %v800_v57 = vadd.f32 %v798_v3, %v727_v13  ;;  %v801_v58 = vadd.f32 %v799_v44, %v728_v10 }
 0x11c   : > { %v824_v39 = vpop.f32.mrf.mxu2  ;;  %v844_v43 = vpop.f32.mrf.mxu3 }
 0x11d   : > { %v871_v55 = vmul.f32 %v869_v35, %v824_v39  ;;  %v872_v56 = vmul.f32 %v870_v15, %v844_v43 }
 0x11f   : > { %v873_v20 = vadd.f32 %v871_v55, %v800_v57  ;;  %v874_v12 = vadd.f32 %v872_v56, %v801_v58 }
 0x127   : > { %v897_v49 = vpop.f32.mrf.mxu0  ;;  %v917_v51 = vpop.f32.mrf.mxu1 }
 0x128   : > { %v944_v11 = vmul.f32 %v942_v7, %v897_v49  ;;  %v945_v59 = vmul.f32 %v943_v46, %v917_v51 }
 0x12a   : > { %v946_v2 = vadd.f32 %v944_v11, %v873_v20  ;;  %v947_v26 = vadd.f32 %v945_v59, %v874_v12 }
 0x12e   : > { %v970_v61 = vpop.f32.mrf.mxu2  ;;  %v990_v0 = vpop.f32.mrf.mxu3 }
 0x12f   : > { %v1017_v4 = vmul.f32 %v1015_v24, %v970_v61  ;;  %v1018_v40 = vmul.f32 %v1016_v21, %v990_v0 }
 0x131   : > { %v1019_v47 = vadd.f32 %v1017_v4, %v946_v2  ;;  %v1020_v62 = vadd.f32 %v1018_v40, %v947_v26 }
 0x133   : > { %1021 = vst [vmem:[%s178_s16] sm:$0xff] %v1019_v47 }
 0x134   : > { %1022 = vst [vmem:[%s178_s16 + $0x8] sm:$0xff] %v1020_v62 }
 0x135   : > { %1312 = shalt.err (!%p1309_p9)
}
 0x136   : > { %1172 = dma.vmem_to_hbm [thread:$0]  (%p1435_p13), %s1038_s13, 256, %s1040_s14, %s1024_s15  }
 0x137 PF: > { %s1051_s3 = sand.u32 1, %s1343_s9   ;;  %p2051_p10 = scmp.ge.s32.totalorder %s1355_s12, 2 }
 0x138   : > { %s1052_s29 = scalar_lea.sflag [#allocation4], %s1051_s3 }
 0x139   : > { %p1183_p11 = pnand %p2051_p10, %p1440_p4 }
 0x13b   : > { %p1184_p0 = pneg %p1183_p11 }
 0x13d   : > { %1338 = dma.done.wait (%p1184_p0), %s1052_s29, 256  }
 0x13e   : > { %1340 = vsyncadd (%p1184_p0), %s1052_s29, 4294967040  ;;  %p16_p2 = scmp.ge.s32.totalorder %s1415_s23, 4   ;;  %s2052_s9 = smov %s1347_s10 }
 0x13f   : > { %s2053_s10 = smov %s1351_s11  ;;  %s2054_s11 = smov %s1427_s26 }
 0x140   : > { %s2055_s12 = smov %s1415_s23  ;;  %18 = sbr.rel (!%p16_p2) target bundleno = 6 (0x6), region = 84 }
 0x145   :  { %1058 = vsyncpa [#allocation3], 1 }
 0x146   :  { %1060 = vsyncpa [#allocation3 + $0x1], 1 }
 0x147   :  { %1061 = vsyncpa [#allocation6], 1 }
 0x148   :  { %1062 = vsyncpa [#allocation4], 1 }
 0x149   :  { %1064 = vsyncpa [#allocation4 + $0x1], 1 }

</bundles_post_ra>
